<compile_context>
chip_gen: v6e
topology: v6e:2x2x1
jax: 0.10.0
libtpu: 0.0.40
codegen_flags: <defaults>
</compile_context>

<pallas_src>
import functools

import jax
import jax.numpy as jnp
from jax.experimental import pallas as pl
from jax.experimental.pallas import tpu as pltpu


_TAPS = tuple((dy, dx) for dy in (-1, 0, 1) for dx in (-1, 0, 1))


def _round_up(x, m):
    return ((x + m - 1) // m) * m


def _pick_chunk(S, slice_bytes, max_chunk=8, budget=2 << 20):
    """Largest divisor of S whose double-buffered chunk stays under `budget`."""
    limit = max(1, min(max_chunk, budget // max(1, 2 * slice_bytes)))
    limit = min(limit, S)
    best = 1
    for d in range(1, limit + 1):
        if S % d == 0:
            best = d
    return best


# ---------------------------------------------------------------------------
# fused kernel: one grid step = one batch element x one chunk of slices
# ---------------------------------------------------------------------------

def _corr_kernel(x2d_ref, x3d_ref, wcomb_ref, bf_ref, bw_ref, out_ref,
                 acc_ref, xpad_ref, stack_ref, *, C, W, HW, HWp, G, S_CHUNK):
    c = pl.program_id(1)

    N = 2 * HWp + G            # matmul RHS width: [diff | gap | xj]
    off_xj = HWp + G           # column offset of the xj half (multiple of 128)

    # ---- per-batch init: accumulator carry + zeroed padded scratch ---------
    @pl.when(c == 0)
    def _():
        acc_ref[...] = x2d_ref[0].astype(jnp.float32)
        xpad_ref[...] = jnp.zeros_like(xpad_ref)   # gaps stay zero afterwards

    # ---- hoisted per-chunk constants (resident, never re-fetched from HBM) -
    wcomb = wcomb_ref[...]     # (2C, 9C)
    bf = bf_ref[...]           # (C, 1)
    bw = bw_ref[...]           # (C, 1)

    lane = jax.lax.broadcasted_iota(jnp.int32, (1, N), 1)
    col = jnp.where(lane < HWp, lane, lane - off_xj) % W
    mask_l = (col >= 1).astype(jnp.float32)        # source x-1 must be >= 0
    mask_r = (col < W - 1).astype(jnp.float32)     # source x+1 must be <  W
    if HWp != HW:
        out_lane = jax.lax.broadcasted_iota(jnp.int32, (1, HWp), 1)
        tail_mask = (out_lane < HW).astype(jnp.float32)

    acc = acc_ref[...]         # (C, HWp) f32 running feats_2d

    # ---- serial recurrence over this chunk's slices -------------------------
    # Static unroll (S_CHUNK is small): every slice start is a static multiple
    # of 128, and LLO can overlap slice j+1's stack build with slice j's MXU
    # drain / EUP tanh.
    for j in range(S_CHUNK):
        xj = x3d_ref[0, :, j * HWp:(j + 1) * HWp].astype(jnp.float32)  # (C,HWp)
        diff = acc - xj

        # padded layout: [G zeros | diff (HWp) | G zeros | xj (HWp) | G zeros]
        xpad_ref[:, G:G + HWp] = diff
        xpad_ref[:, 2 * G + HWp:2 * G + 2 * HWp] = xj
        xp = xpad_ref[...]                                  # (C, 3G + 2*HWp)

        # im2col: 9 static lane slices of the padded buffer -> (9C, N) scratch
        for t, (dy, dx) in enumerate(_TAPS):
            s = dy * W + dx
            piece = xp[:, G + s:G + s + N]
            if dx == -1:
                piece = piece * mask_l
            elif dx == 1:
                piece = piece * mask_r
            stack_ref[t * C:(t + 1) * C, :] = piece

        # ONE MXU matmul = both 3x3 convolutions of this slice:
        #   rows [:C] -> Wf, rows [C:] -> Ww ; cols [:HWp] -> diff, [off_xj:] -> xj
        y = jnp.dot(wcomb, stack_ref[...], preferred_element_type=jnp.float32)
        cw = y[C:, 0:HWp] + bw                       # conv_w(acc - xj)
        cf = y[:C, off_xj:off_xj + HWp] + bf         # conv_f(xj)
        ot = jnp.abs(jnp.tanh(cw)) * cf
        if HWp != HW:
            ot = ot * tail_mask                      # keep the padded tail zero
        acc = acc + ot

    acc_ref[...] = acc
    out_ref[0] = acc.astype(out_ref.dtype)


# ---------------------------------------------------------------------------
# wrapper
# ---------------------------------------------------------------------------

def correlation_unit_2(feats_2d, feats_3d, w_f, b_f, w_w, b_w):
    """feats_2d: (B, C, H, W) NCHW ; feats_3d: (B, C, S, H, W) NCDHW."""
    B, C, H, W = feats_2d.shape
    S = feats_3d.shape[2]
    HW = H * W
    HWp = _round_up(HW, 128)           # lane-dense flattened-spatial axis
    G = _round_up(W + 1, 128)          # zero gap >= one padded row, aligned

    # glue: layout only — feats_3d is never transposed, only (free) reshaped.
    x2d = feats_2d.reshape(B, C, HW)
    x3d = feats_3d.reshape(B, C, S, HW)
    if HWp != HW:
        x2d = jnp.pad(x2d, ((0, 0), (0, 0), (0, HWp - HW)))
        x3d = jnp.pad(x3d, ((0, 0), (0, 0), (0, 0), (0, HWp - HW)))
    x3d = x3d.reshape(B, C, S * HWp)

    # conv weights (Cout, Cin, 3, 3) -> (Cout, 9*Cin) with (ky, kx, ci) tap
    # order matching the stack rows; [Wf ; Ww] stacked for the single matmul.
    wf = jnp.transpose(w_f, (0, 2, 3, 1)).reshape(C, 9 * C)
    ww = jnp.transpose(w_w, (0, 2, 3, 1)).reshape(C, 9 * C)
    wcomb = jnp.concatenate([wf, ww], axis=0).astype(jnp.float32)   # (2C, 9C)
    bf2 = b_f.reshape(C, 1).astype(jnp.float32)
    bw2 = b_w.reshape(C, 1).astype(jnp.float32)

    slice_bytes = C * HWp * x3d.dtype.itemsize
    S_CHUNK = _pick_chunk(S, slice_bytes)
    n_chunks = S // S_CHUNK

    kernel = functools.partial(_corr_kernel, C=C, W=W, HW=HW, HWp=HWp, G=G,
                               S_CHUNK=S_CHUNK)

    out = pl.pallas_call(
        kernel,
        out_shape=jax.ShapeDtypeStruct((B, C, HWp), feats_2d.dtype),
        grid_spec=pltpu.PrefetchScalarGridSpec(
            num_scalar_prefetch=0,
            grid=(B, n_chunks),
            in_specs=[
                pl.BlockSpec((1, C, HWp), lambda b, c: (b, 0, 0)),            # feats_2d
                pl.BlockSpec((1, C, S_CHUNK * HWp), lambda b, c: (b, 0, c)),  # slice chunk
                pl.BlockSpec((2 * C, 9 * C), lambda b, c: (0, 0)),            # [Wf ; Ww]
                pl.BlockSpec((C, 1), lambda b, c: (0, 0)),                    # b_f
                pl.BlockSpec((C, 1), lambda b, c: (0, 0)),                    # b_w
            ],
            out_specs=pl.BlockSpec((1, C, HWp), lambda b, c: (b, 0, 0)),
            scratch_shapes=[
                pltpu.VMEM((C, HWp), jnp.float32),               # running acc
                pltpu.VMEM((C, 3 * G + 2 * HWp), jnp.float32),   # zero-gapped pad
                pltpu.VMEM((9 * C, 2 * HWp + G), jnp.float32),   # im2col stack
            ],
        ),
        compiler_params=pltpu.CompilerParams(
            dimension_semantics=("parallel", "arbitrary")),
    )(x2d, x3d, wcomb, bf2, bw2)

    if HWp != HW:
        out = out[:, :, :HW]
    return out.reshape(B, C, H, W)


# ---------------------------------------------------------------------------
# pure-JAX reference (validation)
# ---------------------------------------------------------------------------

def _reference(feats_2d, feats_3d, w_f, b_f, w_w, b_w):
    def conv(x, w, b):
        y = jax.lax.conv_general_dilated(
            x, w, window_strides=(1, 1), padding=((1, 1), (1, 1)),
            dimension_numbers=("NCHW", "OIHW", "NCHW"))
        return y + b[None, :, None, None]

    S = feats_3d.shape[2]
    f2 = feats_2d
    ms = f2
    for s in range(S):
        xj = feats_3d[:, :, s]
        f_diff = jnp.abs(jnp.tanh(conv(f2 - xj, w_w, b_w)))
        ot = f_diff * conv(xj, w_f, b_f)
        ms = ot + f2
        f2 = ms
    return ms


if __name__ == "__main__":
    B, C, S, H, W = 2, 4, 3, 16, 16

    key = jax.random.PRNGKey(0)
    k1, k2, k3, k4, k5, k6 = jax.random.split(key, 6)

    feats_2d = jax.random.normal(k1, (B, C, H, W), jnp.float32)
    feats_3d = jax.random.normal(k2, (B, C, S, H, W), jnp.float32)

    # deterministic synthetic parameters (nn.Conv2d(C, C, 3, padding=1) shapes)
    w_f = 0.3 * jax.random.normal(k3, (C, C, 3, 3), jnp.float32)
    b_f = 0.1 * jax.random.normal(k4, (C,), jnp.float32)
    w_w = 0.3 * jax.random.normal(k5, (C, C, 3, 3), jnp.float32)
    b_w = 0.1 * jax.random.normal(k6, (C,), jnp.float32)

    out = correlation_unit_2(feats_2d, feats_3d, w_f, b_f, w_w, b_w)
    out = jax.block_until_ready(out)

    ref = _reference(feats_2d, feats_3d, w_f, b_f, w_w, b_w)
    err = float(jnp.max(jnp.abs(out - ref)))
    if err > 1e-3:
        raise AssertionError(f"Pallas kernel mismatch vs reference: max |err| = {err}")

    print("KERNEL_OK")
</pallas_src>

<mosaic_0001>
module attributes {stable_mosaic.version = 11 : i64} {
  func.func @_corr_kernel(%arg0: i32, %arg1: i32, %arg2: memref<1x4x256xf32, #tpu.memory_space<vmem>>, %arg3: memref<1x4x768xf32, #tpu.memory_space<vmem>>, %arg4: memref<8x36xf32, #tpu.memory_space<vmem>>, %arg5: memref<4x1xf32, #tpu.memory_space<vmem>>, %arg6: memref<4x1xf32, #tpu.memory_space<vmem>>, %arg7: memref<1x4x256xf32, #tpu.memory_space<vmem>>, %arg8: memref<4x256xf32, #tpu.memory_space<vmem>>, %arg9: memref<4x896xf32, #tpu.memory_space<vmem>>, %arg10: memref<36x640xf32, #tpu.memory_space<vmem>>) attributes {dimension_semantics = [#tpu.dimension_semantics<parallel>, #tpu.dimension_semantics<arbitrary>], iteration_bounds = array<i64: 2, 1>, scalar_prefetch = 0 : i64, scratch_operands = 3 : i64, tpu.core_type = #tpu.core_type<tc>, window_params = [{transform_indices = @transform_0, window_bounds = array<i64: 1, 4, 256>}, {transform_indices = @transform_1, window_bounds = array<i64: 1, 4, 768>}, {pipeline_mode = #tpu.pipeline_mode<synchronous>, transform_indices = @transform_2, window_bounds = array<i64: 8, 36>}, {pipeline_mode = #tpu.pipeline_mode<synchronous>, transform_indices = @transform_3, window_bounds = array<i64: 4, 1>}, {pipeline_mode = #tpu.pipeline_mode<synchronous>, transform_indices = @transform_4, window_bounds = array<i64: 4, 1>}, {transform_indices = @transform_5, window_bounds = array<i64: 1, 4, 256>}]} {
    %c0_i32 = arith.constant 0 : i32
    %0 = arith.cmpi eq, %arg1, %c0_i32 : i32
    %1 = arith.extui %0 : i1 to i32
    %c0_i32_0 = arith.constant 0 : i32
    %2 = arith.cmpi ne, %1, %c0_i32_0 : i32
    scf.if %2 {
      %c0_96 = arith.constant 0 : index
      %c0_97 = arith.constant 0 : index
      %c0_98 = arith.constant 0 : index
      %185 = vector.load %arg2[%c0_96, %c0_97, %c0_98] : memref<1x4x256xf32, #tpu.memory_space<vmem>>, vector<1x4x256xf32>
      %186 = vector.shape_cast %185 : vector<1x4x256xf32> to vector<4x256xf32>
      %c0_99 = arith.constant 0 : index
      %c0_100 = arith.constant 0 : index
      %187 = vector.load %arg8[%c0_99, %c0_100] : memref<4x256xf32, #tpu.memory_space<vmem>>, vector<4x256xf32>
      tpu.vector_store %arg8[%c0_99, %c0_100], %186 {strides = array<i32>} : memref<4x256xf32, #tpu.memory_space<vmem>>, vector<4x256xf32>,
      %cst_101 = arith.constant 0.000000e+00 : f32
      %188 = vector.broadcast %cst_101 : f32 to vector<4x896xf32>
      %c0_102 = arith.constant 0 : index
      %c0_103 = arith.constant 0 : index
      %189 = vector.load %arg9[%c0_102, %c0_103] : memref<4x896xf32, #tpu.memory_space<vmem>>, vector<4x896xf32>
      tpu.vector_store %arg9[%c0_102, %c0_103], %188 {strides = array<i32>} : memref<4x896xf32, #tpu.memory_space<vmem>>, vector<4x896xf32>,
    } else {
    }
    %c0 = arith.constant 0 : index
    %c0_1 = arith.constant 0 : index
    %3 = vector.load %arg4[%c0, %c0_1] : memref<8x36xf32, #tpu.memory_space<vmem>>, vector<8x36xf32>
    %c0_2 = arith.constant 0 : index
    %c0_3 = arith.constant 0 : index
    %4 = vector.load %arg5[%c0_2, %c0_3] : memref<4x1xf32, #tpu.memory_space<vmem>>, vector<4x1xf32>
    %c0_4 = arith.constant 0 : index
    %c0_5 = arith.constant 0 : index
    %5 = vector.load %arg6[%c0_4, %c0_5] : memref<4x1xf32, #tpu.memory_space<vmem>>, vector<4x1xf32>
    %6 = tpu.iota {dimensions = array<i32: 1>} : vector<1x640xi32>
    %c256_i32 = arith.constant 256 : i32
    %7 = vector.broadcast %c256_i32 : i32 to vector<1x640xi32>
    %8 = arith.cmpi slt, %6, %7 : vector<1x640xi32>
    %c384_i32 = arith.constant 384 : i32
    %9 = vector.broadcast %c384_i32 : i32 to vector<1x640xi32>
    %10 = arith.subi %6, %9 : vector<1x640xi32>
    %11 = arith.select %8, %6, %10 : vector<1x640xi1>, vector<1x640xi32>
    %c16_i32 = arith.constant 16 : i32
    %c0_i32_6 = arith.constant 0 : i32
    %12 = arith.cmpi eq, %c16_i32, %c0_i32_6 : i32
    %c1_i32 = arith.constant 1 : i32
    %13 = arith.select %12, %c1_i32, %c16_i32 : i32
    %14 = vector.broadcast %13 : i32 to vector<1x640xi32>
    %15 = arith.remsi %11, %14 : vector<1x640xi32>
    %c0_i32_7 = arith.constant 0 : i32
    %16 = vector.broadcast %c0_i32_7 : i32 to vector<1x640xi32>
    %17 = arith.cmpi ne, %15, %16 : vector<1x640xi32>
    %c0_i32_8 = arith.constant 0 : i32
    %18 = vector.broadcast %c0_i32_8 : i32 to vector<1x640xi32>
    %19 = arith.cmpi slt, %15, %18 : vector<1x640xi32>
    %c0_i32_9 = arith.constant 0 : i32
    %20 = arith.cmpi slt, %13, %c0_i32_9 : i32
    %21 = vector.broadcast %20 : i1 to vector<1x640xi1>
    %22 = vector.broadcast %21 : vector<1x640xi1> to vector<1x640xi1>
    %23 = arith.xori %19, %22 : vector<1x640xi1>
    %24 = arith.andi %23, %17 : vector<1x640xi1>
    %25 = vector.broadcast %13 : i32 to vector<1x640xi32>
    %26 = arith.addi %15, %25 : vector<1x640xi32>
    %27 = arith.select %24, %26, %15 : vector<1x640xi1>, vector<1x640xi32>
    %c1_i32_10 = arith.constant 1 : i32
    %28 = vector.broadcast %c1_i32_10 : i32 to vector<1x640xi32>
    %29 = arith.cmpi sge, %27, %28 : vector<1x640xi32>
    %30 = arith.extui %29 : vector<1x640xi1> to vector<1x640xi32>
    %31 = arith.sitofp %30 : vector<1x640xi32> to vector<1x640xf32>
    %c15_i32 = arith.constant 15 : i32
    %32 = vector.broadcast %c15_i32 : i32 to vector<1x640xi32>
    %33 = arith.cmpi slt, %27, %32 : vector<1x640xi32>
    %34 = arith.extui %33 : vector<1x640xi1> to vector<1x640xi32>
    %35 = arith.sitofp %34 : vector<1x640xi32> to vector<1x640xf32>
    %c0_11 = arith.constant 0 : index
    %c0_12 = arith.constant 0 : index
    %36 = vector.load %arg8[%c0_11, %c0_12] : memref<4x256xf32, #tpu.memory_space<vmem>>, vector<4x256xf32>
    %c0_13 = arith.constant 0 : index
    %c0_14 = arith.constant 0 : index
    %c0_15 = arith.constant 0 : index
    %37 = vector.load %arg3[%c0_13, %c0_14, %c0_15] : memref<1x4x768xf32, #tpu.memory_space<vmem>>, vector<1x4x256xf32>
    %38 = vector.shape_cast %37 : vector<1x4x256xf32> to vector<4x256xf32>
    %39 = arith.subf %36, %38 : vector<4x256xf32>
    %c0_16 = arith.constant 0 : index
    %c128 = arith.constant 128 : index
    %40 = vector.load %arg9[%c0_16, %c128] : memref<4x896xf32, #tpu.memory_space<vmem>>, vector<4x256xf32>
    tpu.vector_store %arg9[%c0_16, %c128], %39 {strides = array<i32>} : memref<4x896xf32, #tpu.memory_space<vmem>>, vector<4x256xf32>,
    %c0_17 = arith.constant 0 : index
    %c512 = arith.constant 512 : index
    %41 = vector.load %arg9[%c0_17, %c512] : memref<4x896xf32, #tpu.memory_space<vmem>>, vector<4x256xf32>
    tpu.vector_store %arg9[%c0_17, %c512], %38 {strides = array<i32>} : memref<4x896xf32, #tpu.memory_space<vmem>>, vector<4x256xf32>,
    %c0_18 = arith.constant 0 : index
    %c0_19 = arith.constant 0 : index
    %42 = vector.load %arg9[%c0_18, %c0_19] : memref<4x896xf32, #tpu.memory_space<vmem>>, vector<4x896xf32>
    %43 = vector.extract_strided_slice %42 {offsets = [0, 111], sizes = [4, 640], strides = [1, 1]} : vector<4x896xf32> to vector<4x640xf32>
    %44 = vector.broadcast %31 : vector<1x640xf32> to vector<4x640xf32>
    %45 = arith.mulf %43, %44 : vector<4x640xf32>
    %c0_20 = arith.constant 0 : index
    %c0_21 = arith.constant 0 : index
    %46 = vector.load %arg10[%c0_20, %c0_21] : memref<36x640xf32, #tpu.memory_space<vmem>>, vector<4x640xf32>
    tpu.vector_store %arg10[%c0_20, %c0_21], %45 {strides = array<i32>} : memref<36x640xf32, #tpu.memory_space<vmem>>, vector<4x640xf32>,
    %47 = vector.extract_strided_slice %42 {offsets = [0, 112], sizes = [4, 640], strides = [1, 1]} : vector<4x896xf32> to vector<4x640xf32>
    %c4 = arith.constant 4 : index
    %c0_22 = arith.constant 0 : index
    %48 = vector.load %arg10[%c4, %c0_22] : memref<36x640xf32, #tpu.memory_space<vmem>>, vector<4x640xf32>
    tpu.vector_store %arg10[%c4, %c0_22], %47 {strides = array<i32>} : memref<36x640xf32, #tpu.memory_space<vmem>>, vector<4x640xf32>,
    %49 = vector.extract_strided_slice %42 {offsets = [0, 113], sizes = [4, 640], strides = [1, 1]} : vector<4x896xf32> to vector<4x640xf32>
    %50 = vector.broadcast %35 : vector<1x640xf32> to vector<4x640xf32>
    %51 = arith.mulf %49, %50 : vector<4x640xf32>
    %c8 = arith.constant 8 : index
    %c0_23 = arith.constant 0 : index
    %52 = vector.load %arg10[%c8, %c0_23] : memref<36x640xf32, #tpu.memory_space<vmem>>, vector<4x640xf32>
    tpu.vector_store %arg10[%c8, %c0_23], %51 {strides = array<i32>} : memref<36x640xf32, #tpu.memory_space<vmem>>, vector<4x640xf32>,
    %53 = vector.extract_strided_slice %42 {offsets = [0, 127], sizes = [4, 640], strides = [1, 1]} : vector<4x896xf32> to vector<4x640xf32>
    %54 = vector.broadcast %31 : vector<1x640xf32> to vector<4x640xf32>
    %55 = arith.mulf %53, %54 : vector<4x640xf32>
    %c12 = arith.constant 12 : index
    %c0_24 = arith.constant 0 : index
    %56 = vector.load %arg10[%c12, %c0_24] : memref<36x640xf32, #tpu.memory_space<vmem>>, vector<4x640xf32>
    tpu.vector_store %arg10[%c12, %c0_24], %55 {strides = array<i32>} : memref<36x640xf32, #tpu.memory_space<vmem>>, vector<4x640xf32>,
    %57 = vector.extract_strided_slice %42 {offsets = [0, 128], sizes = [4, 640], strides = [1, 1]} : vector<4x896xf32> to vector<4x640xf32>
    %c16 = arith.constant 16 : index
    %c0_25 = arith.constant 0 : index
    %58 = vector.load %arg10[%c16, %c0_25] : memref<36x640xf32, #tpu.memory_space<vmem>>, vector<4x640xf32>
    tpu.vector_store %arg10[%c16, %c0_25], %57 {strides = array<i32>} : memref<36x640xf32, #tpu.memory_space<vmem>>, vector<4x640xf32>,
    %59 = vector.extract_strided_slice %42 {offsets = [0, 129], sizes = [4, 640], strides = [1, 1]} : vector<4x896xf32> to vector<4x640xf32>
    %60 = vector.broadcast %35 : vector<1x640xf32> to vector<4x640xf32>
    %61 = arith.mulf %59, %60 : vector<4x640xf32>
    %c20 = arith.constant 20 : index
    %c0_26 = arith.constant 0 : index
    %62 = vector.load %arg10[%c20, %c0_26] : memref<36x640xf32, #tpu.memory_space<vmem>>, vector<4x640xf32>
    tpu.vector_store %arg10[%c20, %c0_26], %61 {strides = array<i32>} : memref<36x640xf32, #tpu.memory_space<vmem>>, vector<4x640xf32>,
    %63 = vector.extract_strided_slice %42 {offsets = [0, 143], sizes = [4, 640], strides = [1, 1]} : vector<4x896xf32> to vector<4x640xf32>
    %64 = vector.broadcast %31 : vector<1x640xf32> to vector<4x640xf32>
    %65 = arith.mulf %63, %64 : vector<4x640xf32>
    %c24 = arith.constant 24 : index
    %c0_27 = arith.constant 0 : index
    %66 = vector.load %arg10[%c24, %c0_27] : memref<36x640xf32, #tpu.memory_space<vmem>>, vector<4x640xf32>
    tpu.vector_store %arg10[%c24, %c0_27], %65 {strides = array<i32>} : memref<36x640xf32, #tpu.memory_space<vmem>>, vector<4x640xf32>,
    %67 = vector.extract_strided_slice %42 {offsets = [0, 144], sizes = [4, 640], strides = [1, 1]} : vector<4x896xf32> to vector<4x640xf32>
    %c28 = arith.constant 28 : index
    %c0_28 = arith.constant 0 : index
    %68 = vector.load %arg10[%c28, %c0_28] : memref<36x640xf32, #tpu.memory_space<vmem>>, vector<4x640xf32>
    tpu.vector_store %arg10[%c28, %c0_28], %67 {strides = array<i32>} : memref<36x640xf32, #tpu.memory_space<vmem>>, vector<4x640xf32>,
    %69 = vector.extract_strided_slice %42 {offsets = [0, 145], sizes = [4, 640], strides = [1, 1]} : vector<4x896xf32> to vector<4x640xf32>
    %70 = vector.broadcast %35 : vector<1x640xf32> to vector<4x640xf32>
    %71 = arith.mulf %69, %70 : vector<4x640xf32>
    %c32 = arith.constant 32 : index
    %c0_29 = arith.constant 0 : index
    %72 = vector.load %arg10[%c32, %c0_29] : memref<36x640xf32, #tpu.memory_space<vmem>>, vector<4x640xf32>
    tpu.vector_store %arg10[%c32, %c0_29], %71 {strides = array<i32>} : memref<36x640xf32, #tpu.memory_space<vmem>>, vector<4x640xf32>,
    %c0_30 = arith.constant 0 : index
    %c0_31 = arith.constant 0 : index
    %73 = vector.load %arg10[%c0_30, %c0_31] : memref<36x640xf32, #tpu.memory_space<vmem>>, vector<36x640xf32>
    %cst = arith.constant dense<0.000000e+00> : vector<8x640xf32>
    %74 = tpu.matmul %3, %73, %cst {dimension_numbers = #tpu.dot_dimension_numbers<[1], [0], [0], [1], [0, 0, 1, 1], [], []>} : vector<8x36xf32>, vector<36x640xf32>, vector<8x640xf32> -> vector<8x640xf32>
    %75 = vector.extract_strided_slice %74 {offsets = [4, 0], sizes = [4, 256], strides = [1, 1]} : vector<8x640xf32> to vector<4x256xf32>
    %76 = vector.broadcast %5 : vector<4x1xf32> to vector<4x256xf32>
    %77 = arith.addf %75, %76 : vector<4x256xf32>
    %78 = vector.extract_strided_slice %74 {offsets = [0, 384], sizes = [4, 256], strides = [1, 1]} : vector<8x640xf32> to vector<4x256xf32>
    %79 = vector.broadcast %4 : vector<4x1xf32> to vector<4x256xf32>
    %80 = arith.addf %78, %79 : vector<4x256xf32>
    %81 = math.tanh %77 : vector<4x256xf32>
    %82 = math.absf %81 : vector<4x256xf32>
    %83 = arith.mulf %82, %80 : vector<4x256xf32>
    %84 = arith.addf %36, %83 : vector<4x256xf32>
    %c0_32 = arith.constant 0 : index
    %c0_33 = arith.constant 0 : index
    %c256 = arith.constant 256 : index
    %85 = vector.load %arg3[%c0_32, %c0_33, %c256] : memref<1x4x768xf32, #tpu.memory_space<vmem>>, vector<1x4x256xf32>
    %86 = vector.shape_cast %85 : vector<1x4x256xf32> to vector<4x256xf32>
    %87 = arith.subf %84, %86 : vector<4x256xf32>
    %c0_34 = arith.constant 0 : index
    %c128_35 = arith.constant 128 : index
    %88 = vector.load %arg9[%c0_34, %c128_35] : memref<4x896xf32, #tpu.memory_space<vmem>>, vector<4x256xf32>
    tpu.vector_store %arg9[%c0_34, %c128_35], %87 {strides = array<i32>} : memref<4x896xf32, #tpu.memory_space<vmem>>, vector<4x256xf32>,
    %c0_36 = arith.constant 0 : index
    %c512_37 = arith.constant 512 : index
    %89 = vector.load %arg9[%c0_36, %c512_37] : memref<4x896xf32, #tpu.memory_space<vmem>>, vector<4x256xf32>
    tpu.vector_store %arg9[%c0_36, %c512_37], %86 {strides = array<i32>} : memref<4x896xf32, #tpu.memory_space<vmem>>, vector<4x256xf32>,
    %c0_38 = arith.constant 0 : index
    %c0_39 = arith.constant 0 : index
    %90 = vector.load %arg9[%c0_38, %c0_39] : memref<4x896xf32, #tpu.memory_space<vmem>>, vector<4x896xf32>
    %91 = vector.extract_strided_slice %90 {offsets = [0, 111], sizes = [4, 640], strides = [1, 1]} : vector<4x896xf32> to vector<4x640xf32>
    %92 = vector.broadcast %31 : vector<1x640xf32> to vector<4x640xf32>
    %93 = arith.mulf %91, %92 : vector<4x640xf32>
    %c0_40 = arith.constant 0 : index
    %c0_41 = arith.constant 0 : index
    %94 = vector.load %arg10[%c0_40, %c0_41] : memref<36x640xf32, #tpu.memory_space<vmem>>, vector<4x640xf32>
    tpu.vector_store %arg10[%c0_40, %c0_41], %93 {strides = array<i32>} : memref<36x640xf32, #tpu.memory_space<vmem>>, vector<4x640xf32>,
    %95 = vector.extract_strided_slice %90 {offsets = [0, 112], sizes = [4, 640], strides = [1, 1]} : vector<4x896xf32> to vector<4x640xf32>
    %c4_42 = arith.constant 4 : index
    %c0_43 = arith.constant 0 : index
    %96 = vector.load %arg10[%c4_42, %c0_43] : memref<36x640xf32, #tpu.memory_space<vmem>>, vector<4x640xf32>
    tpu.vector_store %arg10[%c4_42, %c0_43], %95 {strides = array<i32>} : memref<36x640xf32, #tpu.memory_space<vmem>>, vector<4x640xf32>,
    %97 = vector.extract_strided_slice %90 {offsets = [0, 113], sizes = [4, 640], strides = [1, 1]} : vector<4x896xf32> to vector<4x640xf32>
    %98 = vector.broadcast %35 : vector<1x640xf32> to vector<4x640xf32>
    %99 = arith.mulf %97, %98 : vector<4x640xf32>
    %c8_44 = arith.constant 8 : index
    %c0_45 = arith.constant 0 : index
    %100 = vector.load %arg10[%c8_44, %c0_45] : memref<36x640xf32, #tpu.memory_space<vmem>>, vector<4x640xf32>
    tpu.vector_store %arg10[%c8_44, %c0_45], %99 {strides = array<i32>} : memref<36x640xf32, #tpu.memory_space<vmem>>, vector<4x640xf32>,
    %101 = vector.extract_strided_slice %90 {offsets = [0, 127], sizes = [4, 640], strides = [1, 1]} : vector<4x896xf32> to vector<4x640xf32>
    %102 = vector.broadcast %31 : vector<1x640xf32> to vector<4x640xf32>
    %103 = arith.mulf %101, %102 : vector<4x640xf32>
    %c12_46 = arith.constant 12 : index
    %c0_47 = arith.constant 0 : index
    %104 = vector.load %arg10[%c12_46, %c0_47] : memref<36x640xf32, #tpu.memory_space<vmem>>, vector<4x640xf32>
    tpu.vector_store %arg10[%c12_46, %c0_47], %103 {strides = array<i32>} : memref<36x640xf32, #tpu.memory_space<vmem>>, vector<4x640xf32>,
    %105 = vector.extract_strided_slice %90 {offsets = [0, 128], sizes = [4, 640], strides = [1, 1]} : vector<4x896xf32> to vector<4x640xf32>
    %c16_48 = arith.constant 16 : index
    %c0_49 = arith.constant 0 : index
    %106 = vector.load %arg10[%c16_48, %c0_49] : memref<36x640xf32, #tpu.memory_space<vmem>>, vector<4x640xf32>
    tpu.vector_store %arg10[%c16_48, %c0_49], %105 {strides = array<i32>} : memref<36x640xf32, #tpu.memory_space<vmem>>, vector<4x640xf32>,
    %107 = vector.extract_strided_slice %90 {offsets = [0, 129], sizes = [4, 640], strides = [1, 1]} : vector<4x896xf32> to vector<4x640xf32>
    %108 = vector.broadcast %35 : vector<1x640xf32> to vector<4x640xf32>
    %109 = arith.mulf %107, %108 : vector<4x640xf32>
    %c20_50 = arith.constant 20 : index
    %c0_51 = arith.constant 0 : index
    %110 = vector.load %arg10[%c20_50, %c0_51] : memref<36x640xf32, #tpu.memory_space<vmem>>, vector<4x640xf32>
    tpu.vector_store %arg10[%c20_50, %c0_51], %109 {strides = array<i32>} : memref<36x640xf32, #tpu.memory_space<vmem>>, vector<4x640xf32>,
    %111 = vector.extract_strided_slice %90 {offsets = [0, 143], sizes = [4, 640], strides = [1, 1]} : vector<4x896xf32> to vector<4x640xf32>
    %112 = vector.broadcast %31 : vector<1x640xf32> to vector<4x640xf32>
    %113 = arith.mulf %111, %112 : vector<4x640xf32>
    %c24_52 = arith.constant 24 : index
    %c0_53 = arith.constant 0 : index
    %114 = vector.load %arg10[%c24_52, %c0_53] : memref<36x640xf32, #tpu.memory_space<vmem>>, vector<4x640xf32>
    tpu.vector_store %arg10[%c24_52, %c0_53], %113 {strides = array<i32>} : memref<36x640xf32, #tpu.memory_space<vmem>>, vector<4x640xf32>,
    %115 = vector.extract_strided_slice %90 {offsets = [0, 144], sizes = [4, 640], strides = [1, 1]} : vector<4x896xf32> to vector<4x640xf32>
    %c28_54 = arith.constant 28 : index
    %c0_55 = arith.constant 0 : index
    %116 = vector.load %arg10[%c28_54, %c0_55] : memref<36x640xf32, #tpu.memory_space<vmem>>, vector<4x640xf32>
    tpu.vector_store %arg10[%c28_54, %c0_55], %115 {strides = array<i32>} : memref<36x640xf32, #tpu.memory_space<vmem>>, vector<4x640xf32>,
    %117 = vector.extract_strided_slice %90 {offsets = [0, 145], sizes = [4, 640], strides = [1, 1]} : vector<4x896xf32> to vector<4x640xf32>
    %118 = vector.broadcast %35 : vector<1x640xf32> to vector<4x640xf32>
    %119 = arith.mulf %117, %118 : vector<4x640xf32>
    %c32_56 = arith.constant 32 : index
    %c0_57 = arith.constant 0 : index
    %120 = vector.load %arg10[%c32_56, %c0_57] : memref<36x640xf32, #tpu.memory_space<vmem>>, vector<4x640xf32>
    tpu.vector_store %arg10[%c32_56, %c0_57], %119 {strides = array<i32>} : memref<36x640xf32, #tpu.memory_space<vmem>>, vector<4x640xf32>,
    %c0_58 = arith.constant 0 : index
    %c0_59 = arith.constant 0 : index
    %121 = vector.load %arg10[%c0_58, %c0_59] : memref<36x640xf32, #tpu.memory_space<vmem>>, vector<36x640xf32>
    %cst_60 = arith.constant dense<0.000000e+00> : vector<8x640xf32>
    %122 = tpu.matmul %3, %121, %cst_60 {dimension_numbers = #tpu.dot_dimension_numbers<[1], [0], [0], [1], [0, 0, 1, 1], [], []>} : vector<8x36xf32>, vector<36x640xf32>, vector<8x640xf32> -> vector<8x640xf32>
    %123 = vector.extract_strided_slice %122 {offsets = [4, 0], sizes = [4, 256], strides = [1, 1]} : vector<8x640xf32> to vector<4x256xf32>
    %124 = vector.broadcast %5 : vector<4x1xf32> to vector<4x256xf32>
    %125 = arith.addf %123, %124 : vector<4x256xf32>
    %126 = vector.extract_strided_slice %122 {offsets = [0, 384], sizes = [4, 256], strides = [1, 1]} : vector<8x640xf32> to vector<4x256xf32>
    %127 = vector.broadcast %4 : vector<4x1xf32> to vector<4x256xf32>
    %128 = arith.addf %126, %127 : vector<4x256xf32>
    %129 = math.tanh %125 : vector<4x256xf32>
    %130 = math.absf %129 : vector<4x256xf32>
    %131 = arith.mulf %130, %128 : vector<4x256xf32>
    %132 = arith.addf %84, %131 : vector<4x256xf32>
    %c0_61 = arith.constant 0 : index
    %c0_62 = arith.constant 0 : index
    %c512_63 = arith.constant 512 : index
    %133 = vector.load %arg3[%c0_61, %c0_62, %c512_63] : memref<1x4x768xf32, #tpu.memory_space<vmem>>, vector<1x4x256xf32>
    %134 = vector.shape_cast %133 : vector<1x4x256xf32> to vector<4x256xf32>
    %135 = arith.subf %132, %134 : vector<4x256xf32>
    %c0_64 = arith.constant 0 : index
    %c128_65 = arith.constant 128 : index
    %136 = vector.load %arg9[%c0_64, %c128_65] : memref<4x896xf32, #tpu.memory_space<vmem>>, vector<4x256xf32>
    tpu.vector_store %arg9[%c0_64, %c128_65], %135 {strides = array<i32>} : memref<4x896xf32, #tpu.memory_space<vmem>>, vector<4x256xf32>,
    %c0_66 = arith.constant 0 : index
    %c512_67 = arith.constant 512 : index
    %137 = vector.load %arg9[%c0_66, %c512_67] : memref<4x896xf32, #tpu.memory_space<vmem>>, vector<4x256xf32>
    tpu.vector_store %arg9[%c0_66, %c512_67], %134 {strides = array<i32>} : memref<4x896xf32, #tpu.memory_space<vmem>>, vector<4x256xf32>,
    %c0_68 = arith.constant 0 : index
    %c0_69 = arith.constant 0 : index
    %138 = vector.load %arg9[%c0_68, %c0_69] : memref<4x896xf32, #tpu.memory_space<vmem>>, vector<4x896xf32>
    %139 = vector.extract_strided_slice %138 {offsets = [0, 111], sizes = [4, 640], strides = [1, 1]} : vector<4x896xf32> to vector<4x640xf32>
    %140 = vector.broadcast %31 : vector<1x640xf32> to vector<4x640xf32>
    %141 = arith.mulf %139, %140 : vector<4x640xf32>
    %c0_70 = arith.constant 0 : index
    %c0_71 = arith.constant 0 : index
    %142 = vector.load %arg10[%c0_70, %c0_71] : memref<36x640xf32, #tpu.memory_space<vmem>>, vector<4x640xf32>
    tpu.vector_store %arg10[%c0_70, %c0_71], %141 {strides = array<i32>} : memref<36x640xf32, #tpu.memory_space<vmem>>, vector<4x640xf32>,
    %143 = vector.extract_strided_slice %138 {offsets = [0, 112], sizes = [4, 640], strides = [1, 1]} : vector<4x896xf32> to vector<4x640xf32>
    %c4_72 = arith.constant 4 : index
    %c0_73 = arith.constant 0 : index
    %144 = vector.load %arg10[%c4_72, %c0_73] : memref<36x640xf32, #tpu.memory_space<vmem>>, vector<4x640xf32>
    tpu.vector_store %arg10[%c4_72, %c0_73], %143 {strides = array<i32>} : memref<36x640xf32, #tpu.memory_space<vmem>>, vector<4x640xf32>,
    %145 = vector.extract_strided_slice %138 {offsets = [0, 113], sizes = [4, 640], strides = [1, 1]} : vector<4x896xf32> to vector<4x640xf32>
    %146 = vector.broadcast %35 : vector<1x640xf32> to vector<4x640xf32>
    %147 = arith.mulf %145, %146 : vector<4x640xf32>
    %c8_74 = arith.constant 8 : index
    %c0_75 = arith.constant 0 : index
    %148 = vector.load %arg10[%c8_74, %c0_75] : memref<36x640xf32, #tpu.memory_space<vmem>>, vector<4x640xf32>
    tpu.vector_store %arg10[%c8_74, %c0_75], %147 {strides = array<i32>} : memref<36x640xf32, #tpu.memory_space<vmem>>, vector<4x640xf32>,
    %149 = vector.extract_strided_slice %138 {offsets = [0, 127], sizes = [4, 640], strides = [1, 1]} : vector<4x896xf32> to vector<4x640xf32>
    %150 = vector.broadcast %31 : vector<1x640xf32> to vector<4x640xf32>
    %151 = arith.mulf %149, %150 : vector<4x640xf32>
    %c12_76 = arith.constant 12 : index
    %c0_77 = arith.constant 0 : index
    %152 = vector.load %arg10[%c12_76, %c0_77] : memref<36x640xf32, #tpu.memory_space<vmem>>, vector<4x640xf32>
    tpu.vector_store %arg10[%c12_76, %c0_77], %151 {strides = array<i32>} : memref<36x640xf32, #tpu.memory_space<vmem>>, vector<4x640xf32>,
    %153 = vector.extract_strided_slice %138 {offsets = [0, 128], sizes = [4, 640], strides = [1, 1]} : vector<4x896xf32> to vector<4x640xf32>
    %c16_78 = arith.constant 16 : index
    %c0_79 = arith.constant 0 : index
    %154 = vector.load %arg10[%c16_78, %c0_79] : memref<36x640xf32, #tpu.memory_space<vmem>>, vector<4x640xf32>
    tpu.vector_store %arg10[%c16_78, %c0_79], %153 {strides = array<i32>} : memref<36x640xf32, #tpu.memory_space<vmem>>, vector<4x640xf32>,
    %155 = vector.extract_strided_slice %138 {offsets = [0, 129], sizes = [4, 640], strides = [1, 1]} : vector<4x896xf32> to vector<4x640xf32>
    %156 = vector.broadcast %35 : vector<1x640xf32> to vector<4x640xf32>
    %157 = arith.mulf %155, %156 : vector<4x640xf32>
    %c20_80 = arith.constant 20 : index
    %c0_81 = arith.constant 0 : index
    %158 = vector.load %arg10[%c20_80, %c0_81] : memref<36x640xf32, #tpu.memory_space<vmem>>, vector<4x640xf32>
    tpu.vector_store %arg10[%c20_80, %c0_81], %157 {strides = array<i32>} : memref<36x640xf32, #tpu.memory_space<vmem>>, vector<4x640xf32>,
    %159 = vector.extract_strided_slice %138 {offsets = [0, 143], sizes = [4, 640], strides = [1, 1]} : vector<4x896xf32> to vector<4x640xf32>
    %160 = vector.broadcast %31 : vector<1x640xf32> to vector<4x640xf32>
    %161 = arith.mulf %159, %160 : vector<4x640xf32>
    %c24_82 = arith.constant 24 : index
    %c0_83 = arith.constant 0 : index
    %162 = vector.load %arg10[%c24_82, %c0_83] : memref<36x640xf32, #tpu.memory_space<vmem>>, vector<4x640xf32>
    tpu.vector_store %arg10[%c24_82, %c0_83], %161 {strides = array<i32>} : memref<36x640xf32, #tpu.memory_space<vmem>>, vector<4x640xf32>,
    %163 = vector.extract_strided_slice %138 {offsets = [0, 144], sizes = [4, 640], strides = [1, 1]} : vector<4x896xf32> to vector<4x640xf32>
    %c28_84 = arith.constant 28 : index
    %c0_85 = arith.constant 0 : index
    %164 = vector.load %arg10[%c28_84, %c0_85] : memref<36x640xf32, #tpu.memory_space<vmem>>, vector<4x640xf32>
    tpu.vector_store %arg10[%c28_84, %c0_85], %163 {strides = array<i32>} : memref<36x640xf32, #tpu.memory_space<vmem>>, vector<4x640xf32>,
    %165 = vector.extract_strided_slice %138 {offsets = [0, 145], sizes = [4, 640], strides = [1, 1]} : vector<4x896xf32> to vector<4x640xf32>
    %166 = vector.broadcast %35 : vector<1x640xf32> to vector<4x640xf32>
    %167 = arith.mulf %165, %166 : vector<4x640xf32>
    %c32_86 = arith.constant 32 : index
    %c0_87 = arith.constant 0 : index
    %168 = vector.load %arg10[%c32_86, %c0_87] : memref<36x640xf32, #tpu.memory_space<vmem>>, vector<4x640xf32>
    tpu.vector_store %arg10[%c32_86, %c0_87], %167 {strides = array<i32>} : memref<36x640xf32, #tpu.memory_space<vmem>>, vector<4x640xf32>,
    %c0_88 = arith.constant 0 : index
    %c0_89 = arith.constant 0 : index
    %169 = vector.load %arg10[%c0_88, %c0_89] : memref<36x640xf32, #tpu.memory_space<vmem>>, vector<36x640xf32>
    %cst_90 = arith.constant dense<0.000000e+00> : vector<8x640xf32>
    %170 = tpu.matmul %3, %169, %cst_90 {dimension_numbers = #tpu.dot_dimension_numbers<[1], [0], [0], [1], [0, 0, 1, 1], [], []>} : vector<8x36xf32>, vector<36x640xf32>, vector<8x640xf32> -> vector<8x640xf32>
    %171 = vector.extract_strided_slice %170 {offsets = [4, 0], sizes = [4, 256], strides = [1, 1]} : vector<8x640xf32> to vector<4x256xf32>
    %172 = vector.broadcast %5 : vector<4x1xf32> to vector<4x256xf32>
    %173 = arith.addf %171, %172 : vector<4x256xf32>
    %174 = vector.extract_strided_slice %170 {offsets = [0, 384], sizes = [4, 256], strides = [1, 1]} : vector<8x640xf32> to vector<4x256xf32>
    %175 = vector.broadcast %4 : vector<4x1xf32> to vector<4x256xf32>
    %176 = arith.addf %174, %175 : vector<4x256xf32>
    %177 = math.tanh %173 : vector<4x256xf32>
    %178 = math.absf %177 : vector<4x256xf32>
    %179 = arith.mulf %178, %176 : vector<4x256xf32>
    %180 = arith.addf %132, %179 : vector<4x256xf32>
    %c0_91 = arith.constant 0 : index
    %c0_92 = arith.constant 0 : index
    %181 = vector.load %arg8[%c0_91, %c0_92] : memref<4x256xf32, #tpu.memory_space<vmem>>, vector<4x256xf32>
    tpu.vector_store %arg8[%c0_91, %c0_92], %180 {strides = array<i32>} : memref<4x256xf32, #tpu.memory_space<vmem>>, vector<4x256xf32>,
    %c0_93 = arith.constant 0 : index
    %c0_94 = arith.constant 0 : index
    %c0_95 = arith.constant 0 : index
    %182 = vector.load %arg7[%c0_93, %c0_94, %c0_95] : memref<1x4x256xf32, #tpu.memory_space<vmem>>, vector<1x4x256xf32>
    %183 = vector.shape_cast %182 : vector<1x4x256xf32> to vector<4x256xf32>
    %184 = vector.shape_cast %180 : vector<4x256xf32> to vector<1x4x256xf32>
    tpu.vector_store %arg7[%c0_93, %c0_94, %c0_95], %184 {strides = array<i32>} : memref<1x4x256xf32, #tpu.memory_space<vmem>>, vector<1x4x256xf32>,
    return
  }
  func.func @transform_0(%arg0: i32, %arg1: i32) -> (i32, i32, i32) {
    %c0_i32 = arith.constant 0 : i32
    %c0_i32_0 = arith.constant 0 : i32
    %c0_i32_1 = arith.constant 0 : i32
    return %arg0, %c0_i32, %c0_i32_0 : i32, i32, i32
  }
  func.func @transform_1(%arg0: i32, %arg1: i32) -> (i32, i32, i32) {
    %c0_i32 = arith.constant 0 : i32
    %c0_i32_0 = arith.constant 0 : i32
    return %arg0, %c0_i32, %arg1 : i32, i32, i32
  }
  func.func @transform_2(%arg0: i32, %arg1: i32) -> (i32, i32) {
    %c0_i32 = arith.constant 0 : i32
    %c0_i32_0 = arith.constant 0 : i32
    %c0_i32_1 = arith.constant 0 : i32
    return %c0_i32, %c0_i32_0 : i32, i32
  }
  func.func @transform_3(%arg0: i32, %arg1: i32) -> (i32, i32) {
    %c0_i32 = arith.constant 0 : i32
    %c0_i32_0 = arith.constant 0 : i32
    %c0_i32_1 = arith.constant 0 : i32
    return %c0_i32, %c0_i32_0 : i32, i32
  }
  func.func @transform_4(%arg0: i32, %arg1: i32) -> (i32, i32) {
    %c0_i32 = arith.constant 0 : i32
    %c0_i32_0 = arith.constant 0 : i32
    %c0_i32_1 = arith.constant 0 : i32
    return %c0_i32, %c0_i32_0 : i32, i32
  }
  func.func @transform_5(%arg0: i32, %arg1: i32) -> (i32, i32, i32) {
    %c0_i32 = arith.constant 0 : i32
    %c0_i32_0 = arith.constant 0 : i32
    %c0_i32_1 = arith.constant 0 : i32
    return %arg0, %c0_i32, %c0_i32_0 : i32, i32, i32
  }
}

</mosaic_0001>

<bundles_post_ra>
// kernel: tpu_custom_call.1
= control target key start
LH: loop header
LB: loop body
LE: loop exit
PB: predicated region body
PF: predicated region fallthrough
CT: control target
= control target key end

     0   :  { %s3656_s0 = inlined_call_operand.hbm [shape: f32[2,4,256], index: 0, kind: input, shape index: {}]   ;;  %s3657_s1 = inlined_call_operand.hbm [shape: f32[2,4,768], index: 1, kind: input, shape index: {}]   ;;  %s3658_s2 = inlined_call_operand.vmem [shape: f32[8,36], index: 2, kind: input, shape index: {}]   ;;  %s3659_s3 = inlined_call_operand.vmem [shape: f32[4,1], index: 3, kind: input, shape index: {}]   ;;  %s3660_s4 = inlined_call_operand.vmem [shape: f32[4,1], index: 4, kind: input, shape index: {}]   ;;  %s3661_s5 = inlined_call_operand.hbm [shape: f32[2,4,256], index: 5, kind: output, shape index: {}]  }
   0x1   :  { %3662 = sst [smem:[#allocation14_spill]] %s3656_s0 }
   0x2   :  { %10 = vsyncpa [#allocation6], 0 }
   0x3   :  { %12 = vsyncpa [#allocation6 + $0x1], 0 }
   0x4   :  { %13 = vsyncpa [#allocation9], 0 }
   0x5   :  { %15 = vsyncpa [#allocation9 + $0x1], 0 }
   0x6   :  { %16 = vsyncpa [#allocation7], 0 }
   0x7   :  { %18 = vsyncpa [#allocation7 + $0x1], 0  ;;  %s2755_s18 = smov 0   ;;  %s2757_s19 = smov 0  }
   0x8   :  { %s2759_s20 = smov 0   ;;  %s2761_s21 = smov 0  }
   0x9   :  { %s2763_s22 = smov 0   ;;  %s2765_s23 = smov 0  }
   0xa LB: > { %s2323_s24 = sadd.s32 4294967295, %s2709_s23   ;;  %s2324_s25 = sadd.s32 4294967294, %s2709_s23   ;;  %s2709_s23 = sphi %s2765_s23, %s24_s23   ;;  %s2705_s22 = sphi %s2763_s22, %s3675_s22   ;;  %s2701_s21 = sphi %s2761_s21, %s3674_s21   ;;  %s2697_s20 = sphi %s2759_s20, %s3673_s20   ;;  %s2693_s19 = sphi %s2757_s19, %s3672_s19   ;;  %s2689_s18 = sphi %s2755_s18, %s3671_s18  }
   0xb   : > { %s36_s26 = sadd.s32 1, %s2705_s22  ;;  %s43_s27 = sadd.s32 1, %s2697_s20 }
   0xc   : > { %p38_p0 = scmp.ge.s32.totalorder %s36_s26, 2  ;;  %p50_p1 = scmp.ne.s32.totalorder %s2697_s20, %s2693_s19 }
   0xd   : > { %p51_p2 = scmp.eq.s32.totalorder %s2709_s23, 0  ;;  %p56_p3 = scmp.ne.s32.totalorder %s2693_s19, %s2689_s18 }
   0xe   : > { %s3677_s26 = smov (%p38_p0, %s36_s26), 0  ;;  %p57_p5 = scmp.eq.s32.totalorder %s2323_s24, 0 }
   0xf   : > { %p2796_p4 = por %p51_p2, %p50_p1  ;;  %s40_s29 = ssub.s32 %s2705_s22, %s3677_s26 }
  0x10   : > { %p171_p6 = scmp.eq.s32.totalorder %s2323_s24, 1  ;;  %p41_p7 = scmp.eq.s32.totalorder %s40_s29, 0 }
  0x11   : > { %p2802_p8 = por %p57_p5, %p56_p3  ;;  %p177_p10 = scmp.eq.s32.totalorder %s2324_s25, 1 }
  0x12   : > { %p2806_p9 = por %p171_p6, %p50_p1  ;;  %p2456_p13 = scmp.lt.s32.totalorder %s2709_s23, 2 }
  0x13   : > { %s2811_s7 = scalar_select %p41_p7, %s2697_s20, %s43_s27  }
  0x14   : > { %p2813_p11 = por %p177_p10, %p56_p3  ;;  %s2820_s9 = sand.u32 1, %s2697_s20  }
  0x15   : > { %s2327_s10 = sshll.u32 %s2820_s9, 3  ;;  %s2377_s11 = sshll.u32 %s2705_s22, 7 }
  0x16   : > { %s3667_s0 = sld [smem:[#allocation14_spill]]  ;;  %s210_s15 = scalar_lea.vmem [#allocation5], %s2327_s10 }
  0x17   : > { %s218_s16 = sshll.u32 %s210_s15, 4  ;;  %p2829_p0 = pnand %p2456_p13, %p2796_p4  ;;  %s219_s16 = int_to_ptr.vmem [resolvable:$true] %s218_s16 }
  0x18   : > { %p2331_p1 = scmp.ge.s32.totalorder %s2709_s23, 1  ;;  %p244_p2 = scmp.lt.s32.totalorder %s2709_s23, 3 }
  0x19   : > { %s207_s24 = scalar_lea.sflag [#allocation6], %s2820_s9  ;;  %p2571_p3 = pneg %p2829_p0 }
  0x1a   : > { %s2582_s25 = scalar_lea.vmem %s219_s16, 128  ;;  %s2711_s27 = smov [#allocation5]  }
  0x1b   : > { %p2583_p5 = scmp.ne.s32.totalorder %s219_s16, %s2582_s25  ;;  %s2587_s29 = sshll.u32 %s2711_s27, 4  ;;  %s2588_s29 = int_to_ptr.vmem [resolvable:$false] %s2587_s29 }
  0x1c   : > { %s216_s14 = scalar_lea.hbm %s3667_s0, %s2377_s11  ;;  %s2589_s28 = scalar_lea.vmem %s2588_s29, 256 }
  0x1d   : > { %p2585_p6 = pnand %p2583_p5, %p2571_p3  ;;  %p2590_p4 = scmp.lt.s32.totalorder %s219_s16, %s2588_s29 }
  0x1e   : > { %p2591_p10 = scmp.lt.s32.totalorder %s2589_s28, %s2582_s25 }
  0x1f   : > { %p2586_p7 = pneg %p2585_p6 }
  0x20   : > { %p2592_p13 = por %p2591_p10, %p2590_p4 }
  0x22   : > { %p2593_p12 = pnand %p2592_p13, %p2586_p7 }
  0x24   : > { %2596 = shalt.err (!%p2593_p12)
}
  0x25   : > { %2448 = dma.hbm_to_vmem [thread:$0]  (!%p2829_p0), %s216_s14, 128, %s219_s16, %s207_s24  }
  0x26   : > { %p2847_p5 = pnand %p2331_p1, %p244_p2  ;;  %s2436_s11 = smul.u32 24, %s2820_s9 }
  0x27   : > { %s2437_s12 = smul.u32 384, %s2705_s22  ;;  %s226_s28 = scalar_lea.sflag [#allocation9], %s2820_s9 }
  0x28   : > { %s229_s27 = scalar_lea.vmem [#allocation8], %s2436_s11  ;;  %s2712_s14 = smov [#allocation8]  }
  0x29   : > { %s237_s25 = scalar_lea.hbm %s3657_s1, %s2437_s12  ;;  %s239_s29 = sshll.u32 %s229_s27, 4  ;;  %s240_s29 = int_to_ptr.vmem [resolvable:$true] %s239_s29 }
  0x2a   : > { %s2610_s0 = scalar_lea.vmem %s240_s29, 384  ;;  %s2615_s16 = sshll.u32 %s2712_s14, 4  ;;  %s2616_s16 = int_to_ptr.vmem [resolvable:$false] %s2615_s16 }
  0x2b   : > { %p2611_p12 = scmp.ne.s32.totalorder %s240_s29, %s2610_s0  ;;  %s2617_s24 = scalar_lea.vmem %s2616_s16, 768 }
  0x2c   : > { %p2618_p1 = scmp.lt.s32.totalorder %s240_s29, %s2616_s16  ;;  %p2619_p2 = scmp.lt.s32.totalorder %s2617_s24, %s2610_s0 }
  0x2d   : > { %p2613_p6 = pnand %p2611_p12, %p2571_p3 }
  0x2e   : > { %p2620_p4 = por %p2619_p2, %p2618_p1 }
  0x2f   : > { %p2614_p7 = pneg %p2613_p6 }
  0x31   : > { %p2621_p10 = pnand %p2620_p4, %p2614_p7 }
  0x33   : > { %2624 = shalt.err (!%p2621_p10)
}
  0x34   : > { %2451 = dma.hbm_to_vmem [thread:$0]  (!%p2829_p0), %s237_s25, 384, %s240_s29, %s226_s28  }
  0x35   : > { %248 = sbr.rel (%p2847_p5) target bundleno = 1392 (0x570), region = 40  ;;  %s2865_s9 = sand.u32 (!%p2847_p5), 1, %s2693_s19  }
  0x36   : > { %s2332_s11 = sshll.u32 (!%p2847_p5), %s2865_s9, 3  ;;  %s251_s12 = scalar_lea.sflag (!%p2847_p5), [#allocation6], %s2865_s9 }
  0x37   : > { %s254_s0 = scalar_lea.vmem (!%p2847_p5), [#allocation5], %s2332_s11 }
  0x3a   : > { %2676 = dma.done.wait (%p2802_p8), %s251_s12, 128  }
  0x3b   : > { %2678 = vsyncadd (%p2802_p8), %s251_s12, 4294967168  ;;  %s2438_s17 = smul.u32 24, %s2865_s9  ;;  %s260_s10 = scalar_lea.sflag [#allocation9], %s2865_s9  ;;  %v309_v0 = vlaneseq }
  0x3d   : > { %s2877_s13 = scalar_lea.vmem [#allocation8], %s2438_s17 }
  0x3e   : > { %2680 = dma.done.wait (%p2802_p8), %s260_s10, 384  }
  0x3f   : > { %2682 = vsyncadd (%p2802_p8), %s260_s10, 4294966912  ;;  %v2713_v1 = vmov 0.0   ;;  %v310_v2 = vand.u32 127, %v309_v0  ;;  %v2888_v10 = vld [vmem:[%s254_s0] sm:$0xff]  ;;  %s2714_s30 = smov 127   ;;  %s2715_s15 = smov 113  }
  0x40   : > { %302 = vst [vmem:[#allocation3] sm:$0xff] %v2713_v1  ;;  %303 = vst [vmem:[#allocation3 + $0x8] sm:$0xff] %v2713_v1  ;;  %897 = vmatprep.mubr.f32.mxu0 %v2713_v1  ;;  %968 = vmatprep.mubr.f32.mxu1 %v2713_v1  ;;  %v2891_v11 = vld [vmem:[%s2877_s13] sm:$0xff]  ;;  %s2716_s25 = smov 111   ;;  %v2932_v34 = vld [vmem:[%s2877_s13 + $0x10] sm:$0xff]  ;;  %s2717_s27 = smov 112  }
  0x41   : > { %305 = vst [vmem:[#allocation3 + $0x18] sm:$0xf] %v2713_v1  ;;  %v312_v3 = vadd.s32 256, %v310_v2  ;;  %v314_v4 = vadd.s32 512, %v310_v2  ;;  %v311_v5 = vadd.s32 128, %v310_v2  ;;  %v333_v8 = vand.u32 15, %v310_v2 }
  0x42   : > { %651 = vst [vmem:[#allocation4 + $0x68] sm:$0xf] %v2891_v11  ;;  %v421_v14 = vsub.f32 %v2888_v10, %v2891_v11  ;;  %1642 = vst [vmem:[#allocation3 + $0x10] sm:$0xff] %v2932_v34  ;;  %s2718_s29 = smov 16   ;;  %v2971_v38 = vcombine.low %v2891_v11, %v2891_v11  ;;  %v2719_v40 = vmov 0   ;;  %v644_v45 = vcombine.high %v2891_v11, %v2891_v11  ;;  %s2720_s28 = smov 1  }
  0x43   : > { %v2336_v6 = vadd.s32 4294966912, %v312_v3  ;;  %v2337_v7 = vadd.s32 4294966912, %v314_v4  ;;  %v340_v9 = vand.u32 15, %v311_v5  ;;  %vm389_vm2 = vcmp.ge.s32.totalorder %v333_v8, 1  ;;  %2532 = vset.pattern.permute.xlu0 %v2719_v40  ;;  %2533 = vset.pattern.permute.xlu1 %v2719_v40  ;;  %s2721_s14 = smov 17   ;;  %s2722_s16 = smov 15  }
  0x44   : > { %422 = vst [vmem:[#allocation3 + $0x4] sm:$0xff] %v421_v14  ;;  %v2338_v19 = vsel %vm389_vm2, 1.0, %v2713_v1  ;;  %vm404_vm4 = vcmp.lt.s32.totalorder %v333_v8, 15  ;;  %652 = vst [vmem:[#allocation4 + $0x98] sm:$0xf] %v644_v45  ;;  %vm596_vm11 = vcmask 1039360  }
  0x45   : > { %v344_v12 = vsub.s32 0, %v2336_v6  ;;  %v361_v13 = vand.u32 15, %v2337_v7  ;;  %vm390_vm3 = vcmp.ge.s32.totalorder %v340_v9, 1  ;;  %vm405_vm5 = vcmp.lt.s32.totalorder %v340_v9, 15  ;;  %s2205_s24 = scalar_lea.sflag [#allocation7], %s2865_s9  ;;  %s2724_s0 = smov [#allocation10]  }
  0x46   : > { %v2339_v21 = vsel %vm390_vm3, 1.0, %v2713_v1  ;;  %v2343_v23 = vsel %vm404_vm4, 1.0, %v2713_v1  ;;  %v2344_v24 = vsel %vm405_vm5, 1.0, %v2713_v1  ;;  %vm444_vm12 = vcmask 908288  }
  0x47   : > { %v347_v15 = vand.u32 15, %v344_v12  ;;  %vm393_vm0 = vcmp.ge.s32.totalorder %v361_v13, 1  ;;  %vm408_vm1 = vcmp.lt.s32.totalorder %v361_v13, 15  ;;  %v2912_v25 = vcombine.low %v2338_v19, %v2339_v21 }
  0x48   : > { %v2897_v16 = vsel %vm393_vm0, 1.0, %v2713_v1  ;;  %v2900_v17 = vsel %vm408_vm1, 1.0, %v2713_v1  ;;  %v2920_v30 = vcombine.low %v2343_v23, %v2344_v24  ;;  %v427_v39 = vld [vmem:[#allocation3 + $0x18] sm:$0xf]  ;;  %vm541_vm13 = vcmask 924672  }
  0x49   : > { %591 = vrot.lane.b32.xlu1 %v2897_v16, %s2714_s30  ;;  %536 = vrot.lane.b32.xlu0 %v2900_v17, %s2715_s15  ;;  %v348_v18 = vsub.s32 0, %v347_v15  ;;  %v727_v41 = vcombine.low %v427_v39, %v427_v39  ;;  %vm446_vm14 = vcmask 1043456   ;;  %vm740_vm15 = vcmask 916480  }
  0x4a   : > { %vm509_vm0 = vcmask 130048   ;;  %vm626_vm1 = vcmask 7168   ;;  %vm571_vm2 = vcmask 121856   ;;  %vm475_vm3 = vcmask 138240  }
  0x4b   : > { %vm366_vm6 = vcmp.ne.s32.totalorder %v348_v18, 0  ;;  %vm371_vm7 = vcmp.lt.s32.totalorder %v348_v18, 0  ;;  %v381_v20 = vadd.s32 16, %v348_v18  ;;  %v2916_v28 = vld [vmem:[#allocation3 + $0x8] sm:$0xff]  ;;  %v2938_v35 = vld [vmem:[#allocation3] sm:$0xff]  ;;  %vm814_vm4 = vcmask 293888  }
  0x4c   : > { %vm376_vm8 = vmand %vm371_vm7, %vm366_vm6  ;;  %649 = vst [vmem:[#allocation4 + $0x70] sm:$0xf] %v2916_v28  ;;  %v495_v36 = vcombine.low %v2916_v28, %v2916_v28  ;;  %v494_v37 = vcombine.low %v2938_v35, %v2938_v35  ;;  %v642_v42 = vcombine.high %v2938_v35, %v2938_v35  ;;  %v643_v43 = vcombine.high %v2916_v28, %v2916_v28 }
  0x4d   : > { %439 = vrot.lane.b32.xlu1 %v2897_v16, %s2716_s25  ;;  %v386_v22 = vsel %vm376_vm8, %v381_v20, %v348_v18  ;;  %vm2723_vm5 = vmmov 0  }
  0x4e   : > { %vm391_vm9 = vcmp.ge.s32.totalorder %v386_v22, 1  ;;  %vm406_vm10 = vcmp.lt.s32.totalorder %v386_v22, 15  ;;  %648 = vst [vmem:[#allocation4 + $0xb8] sm:$0xf] %v642_v42  ;;  %650 = vst [vmem:[#allocation4 + $0x18] sm:$0xf] %v643_v43 }
  0x4f   : > { %v2340_v26 = vsel %vm391_vm9, 1.0, %v2713_v1  ;;  %v2345_v27 = vsel %vm406_vm10, 1.0, %v2713_v1 }
  0x50   : > { %v2918_v29 = vcombine.low %v2340_v26, %v2338_v19  ;;  %v2922_v31 = vcombine.low %v2345_v27, %v2343_v23 }
  0x52   : > { %v2527_v32 = vpack.i.bf16 %v2918_v29, %v2912_v25  ;;  %v2522_v33 = vpack.i.bf16 %v2922_v31, %v2920_v30 }
  0x54   : > { %2528 = vrot.lane.b32.xlu1 %v2527_v32, %s2716_s25  ;;  %2518 = vrot.lane.b32.xlu0 %v2527_v32, %s2714_s30 }
  0x58   : > { %2523 = vrot.lane.b32.xlu0 %v2522_v33, %s2715_s15  ;;  %758 = vrot.lane.b32.xlu1 %v2916_v28, %s2716_s25 }
  0x5c   : > { %756 = vrot.lane.b32.xlu0 %v2938_v35, %s2716_s25  ;;  %694 = vrot.lane.b32.xlu1 %v2916_v28, %s2715_s15 }
  0x60   : > { %692 = vrot.lane.b32.xlu0 %v2938_v35, %s2715_s15  ;;  %656 = vrot.lane.b32.xlu1 %v2916_v28, %s2714_s30 }
  0x64   : > { %654 = vrot.lane.b32.xlu0 %v2938_v35, %s2714_s30  ;;  %732 = vrot.lane.b32.xlu1 %v2916_v28, %s2717_s27 }
  0x68   : > { %730 = vrot.lane.b32.xlu0 %v495_v36, %s2717_s27  ;;  %760 = vrot.lane.b32.xlu1 %v2891_v11, %s2716_s25 }
  0x6c   : > { %728 = vrot.lane.b32.xlu0 %v2938_v35, %s2717_s27  ;;  %501 = vrot.lane.b32.xlu1 %v495_v36, %s2718_s29 }
  0x70   : > { %499 = vrot.lane.b32.xlu0 %v2938_v35, %s2718_s29  ;;  %497 = vrot.lane.b32.xlu1 %v494_v37, %s2718_s29 }
  0x74   : > { %696 = vrot.lane.b32.xlu0 %v2891_v11, %s2715_s15  ;;  %658 = vrot.lane.b32.xlu1 %v2891_v11, %s2714_s30 }
  0x78   : > { %762 = vrot.lane.b32.xlu0 %v427_v39, %s2716_s25  ;;  %734 = vrot.lane.b32.xlu1 %v2971_v38, %s2717_s27 }
  0x7c   : > { %736 = vrot.lane.b32.xlu0 %v2891_v11, %s2717_s27  ;;  %660 = vrot.lane.b32.xlu1 %v427_v39, %s2714_s30 }
  0x80   : > { %698 = vrot.lane.b32.xlu0 %v427_v39, %s2715_s15  ;;  %738 = vrot.lane.b32.xlu1 %v727_v41, %s2717_s27 }
  0xbb   : > { %v2985_v44 = vpop.permute.xlu1 %591  ;;  %v2989_v46 = vpop.permute.xlu0 %536 }
  0xbc   : > { %v540_v20 = vrot.slane %v2989_v46, 4 }
  0xbf   : > { %v2991_v47 = vpop.permute.xlu1 %439 }
  0xc0   : > { %v443_v43 = vrot.slane %v2991_v47, 4 }
  0xc6   : > { %v2529_v48 = vpop.permute.xlu1 %2528  ;;  %v2993_v49 = vpop.permute.xlu0 %2518 }
  0xc7   : > { %v2530_v50 = vunpack.i.l.bf16 %v2529_v48  ;;  %v2520_v51 = vunpack.i.l.bf16 %v2993_v49  ;;  %v2531_v54 = vunpack.i.h.bf16 %v2529_v48  ;;  %v2521_v4 = vunpack.i.h.bf16 %v2993_v49 }
  0xc9   : > { %v441_v52 = vrot.slane %v2530_v50, 4  ;;  %v593_v53 = vrot.slane %v2520_v51, 4  ;;  %v442_v0 = vrot.slane %v2531_v54, 4  ;;  %v594_v15 = vrot.slane %v2521_v4, 4 }
  0xca   : > { %v2524_v55 = vpop.permute.xlu0 %2523  ;;  %v2996_v56 = vpop.permute.xlu1 %758 }
  0xcb   : > { %v2526_v57 = vunpack.i.h.bf16 %v2524_v55  ;;  %v2525_v58 = vunpack.i.l.bf16 %v2524_v55  ;;  %v2999_v59 = vsel %vm596_vm11, %v593_v53, %v2520_v51  ;;  %v3004_v61 = vsel %vm444_vm12, %v441_v52, %v2530_v50 }
  0xcc   : > { %v605_v60 = vmul.f32 %v2999_v59, %v2938_v35  ;;  %v454_v63 = vmul.f32 %v3004_v61, %v2938_v35  ;;  %v447_v12 = vsel %vm446_vm14, %v441_v52, %v442_v0  ;;  %v765_v19 = vrot.slane %v2996_v56, 4 }
  0xcd   : > { %v538_v62 = vrot.slane %v2525_v58, 4  ;;  %v539_v5 = vrot.slane %v2526_v57, 4  ;;  %v3028_v24 = vsel %vm444_vm12, %v447_v12, %v2531_v54  ;;  %v598_v39 = vsel %vm446_vm14, %v593_v53, %v594_v15 }
  0xce   : > { %616 = vrot.lane.b32.xlu1 %v605_v60, %s2720_s28  ;;  %v757_v2 = vpop.permute.xlu0 %756  ;;  %v3009_v3 = vpop.permute.xlu1 %694  ;;  %463 = vrot.lane.b32.xlu0 %v454_v63, %s2721_s14  ;;  %v611_v8 = vcombine.low %v605_v60, %v605_v60  ;;  %v460_v23 = vcombine.high %v454_v63, %v454_v63  ;;  %v3049_v45 = vmul.f32 %v3028_v24, %v2916_v28 }
  0xcf   : > { %v3014_v6 = vsel %vm541_vm13, %v538_v62, %v2525_v58  ;;  %v543_v18 = vsel %vm446_vm14, %v538_v62, %v539_v5  ;;  %v764_v21 = vrot.slane %v757_v2, 4  ;;  %v701_v22 = vrot.slane %v3009_v3, 4 }
  0xd0   : > { %v550_v7 = vmul.f32 %v3014_v6, %v2938_v35  ;;  %v3033_v32 = vsel %vm541_vm13, %v543_v18, %v2526_v57  ;;  %v545_v33 = vsel %vm446_vm14, %v539_v5, %v540_v20  ;;  %v3069_v54 = vsel %vm596_vm11, %v598_v39, %v2521_v4 }
  0xd1   : > { %v767_v35 = vsel %vm446_vm14, %v764_v21, %v765_v19  ;;  %v3056_v50 = vmul.f32 %v3033_v32, %v2916_v28  ;;  %v3060_v51 = vsel %vm541_vm13, %v545_v33, %v2989_v46  ;;  %v449_v55 = vsel %vm446_vm14, %v442_v0, %v443_v43 }
  0xd2   : > { %559 = vrot.lane.b32.xlu1 %v550_v7, %s2722_s16  ;;  %v556_v9 = vcombine.high %v550_v7, %v550_v7  ;;  %v693_v13 = vpop.permute.xlu0 %692  ;;  %v3020_v14 = vpop.permute.xlu1 %656  ;;  %614 = vrot.lane.b32.xlu0 %v611_v8, %s2720_s28  ;;  %v768_v40 = vsel %vm444_vm12, %v767_v35, %v2996_v56  ;;  %v595_v2 = vrot.slane %v2985_v44, 4  ;;  %v3085_v4 = vmul.f32 %v3060_v51, %v2891_v11 }
  0xd3   : > { %v700_v26 = vrot.slane %v693_v13, 4  ;;  %v663_v27 = vrot.slane %v3020_v14, 4  ;;  %v775_v48 = vmul.f32 %v768_v40, %v2920_v30  ;;  %v606_v5 = vmul.f32 %v3069_v54, %v2916_v28 }
  0xd4   : > { %v3091_v7 = vsel %vm444_vm12, %v449_v55, %v2991_v47  ;;  %v600_v12 = vsel %vm446_vm14, %v594_v15, %v595_v2 }
  0xd5   : > { %v703_v41 = vsel %vm446_vm14, %v700_v26, %v701_v22  ;;  %v780_v56 = vcombine.high %v775_v48, %v775_v48  ;;  %784 = vst [vmem:[#allocation4 + $0x58] sm:$0xf] %v775_v48  ;;  %v612_v15 = vcombine.low %v606_v5, %v606_v5 }
  0xd6   : > { %561 = vrot.lane.b32.xlu1 %v556_v9, %s2722_s16  ;;  %v655_v36 = vpop.permute.xlu0 %654  ;;  %v3037_v37 = vpop.permute.xlu1 %732  ;;  %465 = vrot.lane.b32.xlu0 %v460_v23, %s2721_s14  ;;  %v704_v49 = vsel %vm541_vm13, %v703_v41, %v3009_v3  ;;  %v3112_v23 = vsel %vm596_vm11, %v600_v12, %v2985_v44 }
  0xd7   : > { %v662_v42 = vrot.slane %v655_v36, 4  ;;  %v713_v52 = vmul.f32 %v704_v49, %v2912_v25  ;;  %785 = vst [vmem:[#allocation4 + $0x50] sm:$0xf] %v780_v56  ;;  %v607_v44 = vmul.f32 %v3112_v23, %v2891_v11 }
  0xd9   : > { %v665_v53 = vsel %vm446_vm14, %v662_v42, %v663_v27  ;;  %v718_v60 = vcombine.high %v713_v52, %v713_v52  ;;  %722 = vst [vmem:[#allocation4 + $0xa0] sm:$0xf] %v713_v52 }
  0xda   : > { %467 = vrot.lane.b32.xlu1 %v3049_v45, %s2721_s14  ;;  %v666_v46 = vsel %vm596_vm11, %v665_v53, %v3020_v14  ;;  %v731_v57 = vpop.permute.xlu0 %730  ;;  %v3074_v58 = vpop.permute.xlu1 %760  ;;  %563 = vrot.lane.b32.xlu0 %v3056_v50, %s2722_s16 }
  0xdb   : > { %v675_v62 = vmul.f32 %v666_v46, %v2920_v30  ;;  %v742_v63 = vsel %vm740_vm15, %v731_v57, %v3037_v37  ;;  %v766_v0 = vrot.slane %v3074_v58, 4  ;;  %723 = vst [vmem:[#allocation4 + $0x20] sm:$0xf] %v718_v60  ;;  %v613_v46 = vcombine.low %v607_v44, %v607_v44 }
  0xdc   : > { %752 = vst [vmem:[#allocation4 + $0x20] sm:$0xf0] %v742_v63  ;;  %v809_v36 = vld [vmem:[#allocation4 + $0x58] sm:$0xf] }
  0xdd   : > { %v681_v8 = vcombine.low %v675_v62, %v675_v62  ;;  %688 = vst [vmem:[#allocation4 + $0x70] sm:$0xf0] %v675_v62  ;;  %v769_v9 = vsel %vm446_vm14, %v765_v19, %v766_v0  ;;  %v3108_v19 = vmul.f32 %v3091_v7, %v2891_v11 }
  0xde   : > { %567 = vrot.lane.b32.xlu1 %v3085_v4, %s2722_s16  ;;  %v770_v13 = vsel %vm444_vm12, %v769_v9, %v3074_v58  ;;  %v729_v18 = vpop.permute.xlu0 %728  ;;  %v3101_v20 = vpop.permute.xlu1 %501  ;;  %620 = vrot.lane.b32.xlu0 %v606_v5, %s2720_s28  ;;  %v810_v41 = vld [vmem:[#allocation4 + $0x50] sm:$0xf]  ;;  %v461_v9 = vcombine.high %v3049_v45, %v3049_v45 }
  0xdf   : > { %687 = vst [vmem:[#allocation4 + $0xb8] sm:$0xf0] %v681_v8  ;;  %v776_v47 = vmul.f32 %v770_v13, %v2922_v31  ;;  %v741_v21 = vsel %vm740_vm15, %v729_v18, %v731_v57  ;;  %2348 = vmatprep.subr.msk.mxu0 %vm446_vm14, %v810_v41  ;;  %v557_v57 = vcombine.high %v3056_v50, %v3056_v50 }
  0xe0   : > { %751 = vst [vmem:[#allocation4 + $0xa0] sm:$0xf0] %v741_v21  ;;  %2349 = vmatpush1.msk.msra.mxu0 %vm446_vm14, %v809_v36  ;;  %v3165_v36 = vld [vmem:[%s2877_s13 + $0x8] sm:$0xff] }
  0xe1   : > { %v781_v26 = vcombine.high %v776_v47, %v776_v47  ;;  %786 = vst [vmem:[#allocation4 + $0x8] sm:$0xf] %v776_v47  ;;  %v558_v47 = vcombine.high %v3085_v4, %v3085_v4  ;;  %v462_v4 = vcombine.high %v3108_v19, %v3108_v19 }
  0xe2   : > { %471 = vrot.lane.b32.xlu1 %v3108_v19, %s2721_s14  ;;  %v500_v33 = vpop.permute.xlu0 %499  ;;  %v498_v35 = vpop.permute.xlu1 %497  ;;  %618 = vrot.lane.b32.xlu0 %v612_v15, %s2720_s28 }
  0xe3   : > { %787 = vst [vmem:[#allocation4 + $0xa8] sm:$0xf] %v781_v26  ;;  %v511_v39 = vsel %vm509_vm0, %v500_v33, %v3101_v20  ;;  %v510_v40 = vsel %vm509_vm0, %v498_v35, %v500_v33  ;;  %v805_v42 = vld [vmem:[#allocation4 + $0x20] sm:$0xff] }
  0xe4   : > { %521 = vst [vmem:[#allocation4] sm:$0xf0] %v511_v39  ;;  %520 = vst [vmem:[#allocation4 + $0xb0] sm:$0xf0] %v510_v40  ;;  %857 = vmatprep.subr.mxu0 %v805_v42  ;;  %v800_v49 = vld [vmem:[#allocation4 + $0x70] sm:$0xff] }
  0xe6   : > { %505 = vrot.lane.b32.xlu1 %v2971_v38, %s2718_s29  ;;  %v697_v43 = vpop.permute.xlu0 %696  ;;  %v659_v48 = vpop.permute.xlu1 %658  ;;  %503 = vrot.lane.b32.xlu0 %v2916_v28, %s2718_s29  ;;  %v799_v56 = vld [vmem:[#allocation4 + $0xb8] sm:$0xff] }
  0xe7   : > { %v702_v52 = vrot.slane %v697_v43, 4  ;;  %v664_v53 = vrot.slane %v659_v48, 4  ;;  %v804_v55 = vld [vmem:[#allocation4 + $0xa0] sm:$0xff] }
  0xe8   : > { %858 = vmatpush1.msra.mxu0 %v804_v55  ;;  %v811_v8 = vld [vmem:[#allocation4 + $0x8] sm:$0xf]  ;;  %v3196_v55 = vmul.f32 %v3165_v36, %v3060_v51 }
  0xe9   : > { %v705_v38 = vsel %vm446_vm14, %v701_v22, %v702_v52  ;;  %v667_v60 = vsel %vm446_vm14, %v663_v27, %v664_v53  ;;  %859 = vmatprep.subr.mxu0 %v800_v49  ;;  %v1083_v49 = vld [vmem:[#allocation3 + $0x18] sm:$0xf] }
  0xea   : > { %622 = vrot.lane.b32.xlu1 %v613_v46, %s2720_s28  ;;  %v706_v28 = vsel %vm541_vm13, %v705_v38, %v697_v43  ;;  %v763_v62 = vpop.permute.xlu0 %762  ;;  %v668_v63 = vsel %vm596_vm11, %v667_v60, %v659_v48  ;;  %v735_v2 = vpop.permute.xlu1 %734  ;;  %v812_v5 = vld [vmem:[#allocation4 + $0xa8] sm:$0xf]  ;;  %860 = vmatpush1.msra.mxu0 %v799_v56  ;;  %v1227_v43 = vcombine.high %v3165_v36, %v3165_v36 }
  0xeb   : > { %565 = vrot.lane.b32.xlu0 %v557_v57, %s2722_s16  ;;  %v714_v3 = vmul.f32 %v706_v28, %v2918_v29  ;;  %v771_v14 = vsel %vm444_vm12, %v766_v0, %v763_v62  ;;  %v676_v22 = vmul.f32 %v668_v63, %v2922_v31  ;;  %v743_v27 = vsel %vm740_vm15, %v3037_v37, %v735_v2 }
  0xec   : > { %v777_v50 = vmul.f32 %v2900_v17, %v771_v14  ;;  %753 = vst [vmem:[#allocation4 + $0x30] sm:$0xf0] %v743_v27  ;;  %2351 = vmatprep.subr.msk.mxu1 %vm446_vm14, %v812_v5  ;;  %v3185_v48 = vcombine.low %v3165_v36, %v3165_v36 }
  0xed   : > { %v719_v12 = vcombine.high %v714_v3, %v714_v3  ;;  %724 = vst [vmem:[#allocation4 + $0x30] sm:$0xf] %v714_v3  ;;  %v682_v13 = vcombine.low %v676_v22, %v676_v22  ;;  %690 = vst [vmem:[#allocation4 + $0x68] sm:$0xf0] %v676_v22  ;;  %2352 = vmatpush1.msk.msra.mxu1 %vm446_vm14, %v811_v8 }
  0xee   : > { %624 = vrot.lane.b32.xlu1 %v607_v44, %s2720_s28  ;;  %788 = vst [vmem:[#allocation4 + $0xc0] sm:$0xf] %v777_v50  ;;  %v737_v58 = vpop.permute.xlu0 %736  ;;  %v661_v0 = vpop.permute.xlu1 %660  ;;  %v308_v44 = vld [vmem:[%s3660_s4] sm:$0xf] }
  0xef   : > { %469 = vrot.lane.b32.xlu0 %v461_v9, %s2721_s14  ;;  %725 = vst [vmem:[#allocation4 + $0x90] sm:$0xf] %v719_v12  ;;  %689 = vst [vmem:[#allocation4 + $0x18] sm:$0xf0] %v682_v13  ;;  %v744_v37 = vsel %vm740_vm15, %v735_v2, %v737_v58  ;;  %v669_v45 = vsel %vm596_vm11, %v664_v53, %v661_v0  ;;  %v307_v53 = vld [vmem:[%s3659_s3] sm:$0xf] }
  0xf0   : > { %754 = vst [vmem:[#allocation4 + $0x90] sm:$0xf0] %v744_v37  ;;  %v677_v18 = vmul.f32 %v2900_v17, %v669_v45 }
  0xf2   : > { %507 = vrot.lane.b32.xlu1 %v2891_v11, %s2718_s29  ;;  %v683_v21 = vcombine.low %v677_v18, %v677_v18  ;;  %v699_v15 = vpop.permute.xlu0 %698  ;;  %v739_v26 = vpop.permute.xlu1 %738 }
  0xf3   : > { %569 = vrot.lane.b32.xlu0 %v558_v47, %s2722_s16  ;;  %v707_v33 = vsel %vm541_vm13, %v702_v52, %v699_v15  ;;  %v745_v35 = vsel %vm740_vm15, %v737_v58, %v739_v26  ;;  %v1306_v52 = vcombine.low %v1083_v49, %v1083_v49 }
  0xf4   : > { %v802_v39 = vld [vmem:[#allocation4 + $0x68] sm:$0xff]  ;;  %691 = vst [vmem:[#allocation4 + $0x98] sm:$0xf0] %v683_v21  ;;  %v715_v40 = vmul.f32 %v2897_v16, %v707_v33  ;;  %755 = vst [vmem:[#allocation4 + $0x38] sm:$0xf0] %v745_v35  ;;  %v806_v11 = vld [vmem:[#allocation4 + $0x30] sm:$0xff] }
  0xf5   : > { %1234 = vst [vmem:[#allocation4 + $0x68] sm:$0xf] %v3165_v36 }
  0xf6   : > { %726 = vst [vmem:[#allocation4 + $0x38] sm:$0xf] %v715_v40  ;;  %v801_v42 = vld [vmem:[#allocation4 + $0x18] sm:$0xff]  ;;  %1054 = vperm.xlu1 %2533, %v307_v53   ;;  %v3222_v40 = vld [vmem:[%s3658_s2] sm:$0xff] }
  0xf7   : > { %473 = vrot.lane.b32.xlu0 %v462_v4, %s2721_s14  ;;  %v807_v41 = vld [vmem:[#allocation4 + $0x90] sm:$0xff] }
  0xf8   : > { %928 = vmatprep.subr.mxu1 %v807_v41 }
  0xf9   : > { %929 = vmatpush1.msra.mxu1 %v806_v11 }
  0xfa   : > { %930 = vmatprep.subr.mxu1 %v802_v39  ;;  %1277 = vrot.lane.b32.xlu1 %v3165_v36, %s2715_s15 }
  0xfb   : > { %1046 = vperm.xlu0 %2532, %v308_v44   ;;  %931 = vmatpush1.msra.mxu1 %v801_v42  ;;  %v3177_v19 = vld [vmem:[#allocation4 + $0x98] sm:$0xff] }
  0xfc   : > { %1235 = vst [vmem:[#allocation4 + $0x98] sm:$0xf] %v1227_v43  ;;  %v813_v43 = vld [vmem:[#allocation4 + $0xc0] sm:$0xf] }
  0xfe   : > { %1340 = vrot.lane.b32.xlu1 %v1083_v49, %s2716_s25 }
  0xff   : > { %1338 = vrot.lane.b32.xlu0 %v3165_v36, %s2716_s25 }
 0x102   : > { %1315 = vrot.lane.b32.xlu1 %v3165_v36, %s2717_s27 }
 0x103   : > { %1241 = vrot.lane.b32.xlu0 %v3165_v36, %s2714_s30 }
 0x106   : > { %1279 = vrot.lane.b32.xlu1 %v1083_v49, %s2715_s15 }
 0x107   : > { %1313 = vrot.lane.b32.xlu0 %v3185_v48, %s2717_s27 }
 0x10b   : > { %1243 = vrot.lane.b32.xlu0 %v1083_v49, %s2714_s30 }
 0x10f   : > { %1317 = vrot.lane.b32.xlu0 %v1306_v52, %s2717_s27 }
 0x113   : > { %1170 = vrot.lane.b32.xlu0 %v3196_v55, %s2722_s16 }
 0x140   : > { %v617_v56 = vpop.permute.xlu1 %616  ;;  %v464_v46 = vpop.permute.xlu0 %463 }
 0x144   : > { %v560_v57 = vpop.permute.xlu1 %559  ;;  %v615_v38 = vpop.permute.xlu0 %614 }
 0x145   : > { %v627_v60 = vsel %vm626_vm1, %v615_v38, %v617_v56 }
 0x146   : > { %637 = vst [vmem:[#allocation4 + $0x28] sm:$0xf0] %v627_v60 }
 0x148   : > { %v562_v28 = vpop.permute.xlu1 %561  ;;  %v466_v63 = vpop.permute.xlu0 %465 }
 0x149   : > { %v572_v62 = vsel %vm571_vm2, %v560_v57, %v562_v28  ;;  %v476_v2 = vsel %vm475_vm3, %v464_v46, %v466_v63 }
 0x14a   : > { %582 = vst [vmem:[#allocation4 + $0x28] sm:$0xf] %v572_v62  ;;  %486 = vst [vmem:[#allocation4 + $0xb0] sm:$0xf] %v476_v2 }
 0x14c   : > { %v468_v5 = vpop.permute.xlu1 %467  ;;  %v564_v3 = vpop.permute.xlu0 %563 }
 0x14d   : > { %v477_v8 = vsel %vm475_vm3, %v466_v63, %v468_v5  ;;  %v573_v14 = vsel %vm571_vm2, %v562_v28, %v564_v3 }
 0x14e   : > { %487 = vst [vmem:[#allocation4] sm:$0xf] %v477_v8  ;;  %583 = vst [vmem:[#allocation4 + $0x40] sm:$0xf] %v573_v14 }
 0x150   : > { %v568_v22 = vpop.permute.xlu1 %567  ;;  %v621_v27 = vpop.permute.xlu0 %620 }
 0x151   : > { %v794_v35 = vld [vmem:[#allocation4 + $0x28] sm:$0xff]  ;;  %v789_v41 = vld [vmem:[#allocation4 + $0xb0] sm:$0xff] }
 0x154   : > { %v472_v50 = vpop.permute.xlu1 %471  ;;  %v619_v9 = vpop.permute.xlu0 %618 }
 0x155   : > { %v628_v12 = vsel %vm626_vm1, %v617_v56, %v619_v9  ;;  %v629_v13 = vsel %vm626_vm1, %v619_v9, %v621_v27  ;;  %v790_v39 = vld [vmem:[#allocation4] sm:$0xff]  ;;  %v808_v56 = vld [vmem:[#allocation4 + $0x38] sm:$0xff] }
 0x156   : > { %638 = vst [vmem:[#allocation4 + $0x40] sm:$0xf0] %v628_v12  ;;  %639 = vst [vmem:[#allocation4 + $0x78] sm:$0xf0] %v629_v13 }
 0x158   : > { %v506_v58 = vpop.permute.xlu1 %505  ;;  %v504_v0 = vpop.permute.xlu0 %503 }
 0x159   : > { %v512_v37 = vsel %vm509_vm0, %v3101_v20, %v504_v0  ;;  %v513_v45 = vsel %vm509_vm0, %v504_v0, %v506_v58 }
 0x15a   : > { %522 = vst [vmem:[#allocation4 + $0x10] sm:$0xf0] %v512_v37  ;;  %523 = vst [vmem:[#allocation4 + $0x48] sm:$0xf0] %v513_v45 }
 0x15c   : > { %v623_v18 = vpop.permute.xlu1 %622 }
 0x15d   : > { %v630_v47 = vsel %vm626_vm1, %v621_v27, %v623_v18  ;;  %v566_v21 = vpop.permute.xlu0 %565  ;;  %v795_v33 = vld [vmem:[#allocation4 + $0x40] sm:$0xff] }
 0x15e   : > { %640 = vst [vmem:[#allocation4 + $0x80] sm:$0xf0] %v630_v47  ;;  %v574_v15 = vsel %vm571_vm2, %v564_v3, %v566_v21  ;;  %v575_v26 = vsel %vm571_vm2, %v566_v21, %v568_v22  ;;  %861 = vmatprep.subr.mxu0 %v795_v33 }
 0x15f   : > { %584 = vst [vmem:[#allocation4 + $0x78] sm:$0xf] %v574_v15  ;;  %585 = vst [vmem:[#allocation4 + $0x80] sm:$0xf] %v575_v26  ;;  %862 = vmatpush1.msra.mxu0 %v794_v35 }
 0x160   : > { %v625_v20 = vpop.permute.xlu1 %624  ;;  %863 = vmatprep.subr.mxu0 %v790_v39 }
 0x161   : > { %v631_v4 = vsel %vm626_vm1, %v623_v18, %v625_v20  ;;  %v470_v11 = vpop.permute.xlu0 %469  ;;  %864 = vmatpush1.msra.mxu0 %v789_v41 }
 0x162   : > { %641 = vst [vmem:[#allocation4 + $0x88] sm:$0xf0] %v631_v4  ;;  %v478_v44 = vsel %vm475_vm3, %v468_v5, %v470_v11  ;;  %v479_v42 = vsel %vm475_vm3, %v470_v11, %v472_v50  ;;  %2350 = vmatmul.mubr.msk.f32.vlgmr.msra.gmra.mxu0 %vm814_vm4, %v3222_v40  ;;  %2397 = vmatprep.subr.mxu0 %v2713_v1 }
 0x163   : > { %488 = vst [vmem:[#allocation4 + $0x10] sm:$0xf] %v478_v44  ;;  %489 = vst [vmem:[#allocation4 + $0x48] sm:$0xf] %v479_v42  ;;  %2398 = vmatpush3.msk.msra.mxu0 %vm446_vm14, %v813_v43  ;;  %2407 = vmatprep.mubr.msk.f32.mxu0 %vm2723_vm5, %v2713_v1 }
 0x164   : > { %v508_v49 = vpop.permute.xlu1 %507  ;;  %2399 = vmatprep.subr.mxu0 %v2713_v1 }
 0x165   : > { %v514_v52 = vsel %vm509_vm0, %v506_v58, %v508_v49  ;;  %v570_v53 = vpop.permute.xlu0 %569  ;;  %2400 = vmatpush3.msra.mxu0 %v808_v56 }
 0x166   : > { %524 = vst [vmem:[#allocation4 + $0x60] sm:$0xf0] %v514_v52  ;;  %v576_v46 = vsel %vm571_vm2, %v568_v22, %v570_v53  ;;  %v797_v57 = vld [vmem:[#allocation4 + $0x80] sm:$0xff]  ;;  %v796_v38 = vld [vmem:[#allocation4 + $0x78] sm:$0xff]  ;;  %2401 = vmatprep.subr.mxu0 %v2713_v1 }
 0x167   : > { %586 = vst [vmem:[#allocation4 + $0x88] sm:$0xf] %v576_v46  ;;  %932 = vmatprep.subr.mxu1 %v797_v57  ;;  %2402 = vmatpush3.msra.mxu0 %v3177_v19 }
 0x168   : > { %933 = vmatpush1.msra.mxu1 %v796_v38  ;;  %2403 = vmatprep.subr.mxu0 %v2713_v1 }
 0x169   : > { %v474_v60 = vpop.permute.xlu0 %473 }
 0x16a   : > { %v480_v28 = vsel %vm475_vm3, %v472_v50, %v474_v60  ;;  %v792_v62 = vld [vmem:[#allocation4 + $0x48] sm:$0xff]  ;;  %v791_v63 = vld [vmem:[#allocation4 + $0x10] sm:$0xff] }
 0x16b   : > { %490 = vst [vmem:[#allocation4 + $0x60] sm:$0xf] %v480_v28  ;;  %934 = vmatprep.subr.mxu1 %v792_v62 }
 0x16c   : > { %935 = vmatpush1.msra.mxu1 %v791_v63 }
 0x16d   : > { %2353 = vmatmul.mubr.msk.f32.vlgmr.msra.gmra.mxu1 %vm814_vm4, %v3222_v40 }
 0x16e   : > { %v798_v2 = vld [vmem:[#allocation4 + $0x88] sm:$0xff]  ;;  %1471 = vmatprep.mubr.f32.mxu1 %v2713_v1 }
 0x16f   : > { %2404 = vmatpush3.msra.mxu0 %v798_v2 }
 0x170   : > { %2405 = vmatprep.subr.mxu0 %v2713_v1 }
 0x171   : > { %v3258_v13 = vpop.permute.xlu1 %1054 }
 0x172   : > { %v793_v19 = vld [vmem:[#allocation4 + $0x60] sm:$0xff] }
 0x173   : > { %2406 = vmatpush3.msra.mxu0 %v793_v19 }
 0x174   : > { %2408 = vmatmul.mubr.msk.f32.vlgmr.msra.gmra.mxu0 %vm814_vm4, %v3222_v40 }
 0x175   : > { %1542 = vmatprep.mubr.f32.mxu0 %v2713_v1  ;;  %v3260_v58 = vpop.permute.xlu1 %1277 }
 0x176   : > { %v1047_v5 = vpop.permute.xlu0 %1046  ;;  %v1283_v26 = vrot.slane %v3260_v58, 4 }
 0x177   : > { %v3267_v47 = vrot.slane %v1047_v5, 4 }
 0x179   : > { %v1341_v37 = vpop.permute.xlu1 %1340 }
 0x17a   : > { %v3247_v8 = vpop.permute.xlu0 %1338 }
 0x17b   : > { %v1344_v0 = vrot.slane %v3247_v8, 4 }
 0x17d   : > { %v1349_v45 = vsel %vm444_vm12, %v1344_v0, %v1341_v37  ;;  %v1316_v15 = vpop.permute.xlu1 %1315 }
 0x17e   : > { %v3249_v3 = vpop.permute.xlu0 %1241  ;;  %v1355_v18 = vmul.f32 %v2900_v17, %v1349_v45 }
 0x17f   : > { %v1247_v22 = vrot.slane %v3249_v3, 4 }
 0x180   : > { %1366 = vst [vmem:[#allocation4 + $0xc0] sm:$0xf] %v1355_v18 }
 0x181   : > { %v1280_v11 = vpop.permute.xlu1 %1279 }
 0x182   : > { %v3251_v14 = vpop.permute.xlu0 %1313  ;;  %v1288_v44 = vsel %vm541_vm13, %v1283_v26, %v1280_v11 }
 0x183   : > { %v1322_v33 = vsel %vm740_vm15, %v3251_v14, %v1316_v15  ;;  %v1294_v42 = vmul.f32 %v2897_v16, %v1288_v44 }
 0x184   : > { %1332 = vst [vmem:[#allocation4 + $0x90] sm:$0xf0] %v1322_v33 }
 0x185   : > { %1305 = vst [vmem:[#allocation4 + $0x38] sm:$0xf] %v1294_v42 }
 0x186   : > { %v1244_v27 = vpop.permute.xlu0 %1243 }
 0x187   : > { %v1252_v50 = vsel %vm596_vm11, %v1247_v22, %v1244_v27 }
 0x188   : > { %v1258_v9 = vmul.f32 %v2900_v17, %v1252_v50 }
 0x18a   : > { %v1264_v12 = vcombine.low %v1258_v9, %v1258_v9  ;;  %v1318_v21 = vpop.permute.xlu0 %1317 }
 0x18b   : > { %v1323_v35 = vsel %vm740_vm15, %v1316_v15, %v1318_v21 }
 0x18c   : > { %1272 = vst [vmem:[#allocation4 + $0x98] sm:$0xf0] %v1264_v12  ;;  %1333 = vst [vmem:[#allocation4 + $0x38] sm:$0xf0] %v1323_v35 }
 0x222   : > { %v899_v20 = vpop.f32.mrf.mxu0 }
 0x223   : > { %v1050_v39 = vadd.f32 %v3267_v47, %v899_v20 }
 0x224   : > { %v901_v4 = vpop.f32.mrf.mxu0 }
 0x225   : > { %2555 = vtanh.f32 %v1050_v39  ;;  %v1051_v41 = vadd.f32 %v3267_v47, %v901_v4 }
 0x227   : > { %2557 = vtanh.f32 %v1051_v41  ;;  %v1191_v41 = vmul.f32 %v3165_v36, %v3112_v23 }
 0x229   : > { %v1197_v44 = vcombine.low %v1191_v41, %v1191_v41 }
 0x22d   : > { %v970_v43 = vpop.f32.mrf.mxu1 }
 0x22e   : > { %v1086_v43 = vmul.f32 %v3165_v36, %v3091_v7 }
 0x22f   : > { %v971_v49 = vpop.f32.mrf.mxu1 }
 0x230   : > { %v1057_v52 = vadd.f32 %v3258_v13, %v971_v49 }
 0x232   : > { %v2556_v53 = vpop.eup %2555  ;;  %v1065_v38 = vrot.slane %v1057_v52, 4  ;;  %v1790_v52 = vcombine.high %v2932_v34, %v2932_v34 }
 0x233   : > { %v1061_v57 = vand.u32 2147483647, %v2556_v53  ;;  %v3325_v53 = vld [vmem:[#allocation4 + $0x98] sm:$0xff] }
 0x234   : > { %v1040_v56 = vpop.f32.mrf.mxu0  ;;  %v2558_v46 = vpop.eup %2557  ;;  %1798 = vst [vmem:[#allocation4 + $0x98] sm:$0xf] %v1790_v52 }
 0x235   : > { %v1058_v60 = vadd.f32 %v3258_v13, %v1040_v56  ;;  %v1062_v28 = vand.u32 2147483647, %v2558_v46  ;;  %v1069_v2 = vmul.f32 %v1065_v38, %v1061_v57  ;;  %v1161_v56 = vcombine.high %v3196_v55, %v3196_v55 }
 0x236   : > { %v2409_v62 = vpop.f32.mrf.mxu0  ;;  %v1092_v57 = vcombine.high %v1086_v43, %v1086_v43  ;;  %v3342_v55 = vcombine.low %v2932_v34, %v2932_v34 }
 0x237   : > { %v1066_v63 = vrot.slane %v1058_v60, 4  ;;  %v3355_v60 = vmul.f32 %v2932_v34, %v3060_v51 }
 0x239   : > { %v1070_v19 = vmul.f32 %v1066_v63, %v1062_v28  ;;  %v3360_v28 = vpop.permute.xlu0 %1170 }
 0x23b   : > { %v1073_v5 = vcombine.high %v1069_v2, %v1070_v19 }
 0x23d   : > { %v3282_v27 = vadd.f32 %v1073_v5, %v2888_v10 }
 0x23f   : > { %v1077_v50 = vsub.f32 %v3282_v27, %v3165_v36 }
 0x241   : > { %1078 = vst [vmem:[#allocation3 + $0x4] sm:$0xff] %v1077_v50 }
 0x248   : > { %v1081_v9 = vld [vmem:[#allocation3 + $0x8] sm:$0xff]  ;;  %v1080_v12 = vld [vmem:[#allocation3] sm:$0xff] }
 0x249   : > { %1336 = vrot.lane.b32.xlu0 %v1081_v9, %s2716_s25  ;;  %1232 = vst [vmem:[#allocation4 + $0x70] sm:$0xf] %v1081_v9  ;;  %1334 = vrot.lane.b32.xlu1 %v1080_v12, %s2716_s25  ;;  %v1226_v37 = vcombine.high %v1081_v9, %v1081_v9  ;;  %v1225_v45 = vcombine.high %v1080_v12, %v1080_v12 }
 0x24a   : > { %v1189_v10 = vmul.f32 %v1080_v12, %v2999_v59  ;;  %v1124_v18 = vcombine.low %v1081_v9, %v1081_v9  ;;  %v1153_v21 = vmul.f32 %v1080_v12, %v3014_v6  ;;  %v1154_v15 = vmul.f32 %v1081_v9, %v3033_v32 }
 0x24b   : > { %1233 = vst [vmem:[#allocation4 + $0x18] sm:$0xf] %v1226_v37  ;;  %1231 = vst [vmem:[#allocation4 + $0xb8] sm:$0xf] %v1225_v45  ;;  %v1085_v33 = vmul.f32 %v1081_v9, %v3028_v24  ;;  %v1084_v35 = vmul.f32 %v1080_v12, %v3004_v61  ;;  %v1123_v20 = vcombine.low %v1080_v12, %v1080_v12 }
 0x24c   : > { %v1190_v39 = vmul.f32 %v1081_v9, %v3069_v54  ;;  %v1159_v4 = vcombine.high %v1153_v21, %v1153_v21  ;;  %v1195_v42 = vcombine.low %v1189_v10, %v1189_v10  ;;  %v1160_v46 = vcombine.high %v1154_v15, %v1154_v15 }
 0x24d   : > { %1275 = vrot.lane.b32.xlu0 %v1081_v9, %s2715_s15  ;;  %1273 = vrot.lane.b32.xlu1 %v1080_v12, %s2715_s15  ;;  %v1090_v49 = vcombine.high %v1084_v35, %v1084_v35 }
 0x24e   : > { %v1196_v11 = vcombine.low %v1190_v39, %v1190_v39 }
 0x251   : > { %1239 = vrot.lane.b32.xlu0 %v1081_v9, %s2714_s30  ;;  %1237 = vrot.lane.b32.xlu1 %v1080_v12, %s2714_s30 }
 0x255   : > { %1311 = vrot.lane.b32.xlu0 %v1081_v9, %s2717_s27  ;;  %1307 = vrot.lane.b32.xlu1 %v1080_v12, %s2717_s27 }
 0x259   : > { %1128 = vrot.lane.b32.xlu1 %v1080_v12, %s2718_s29  ;;  %1200 = vrot.lane.b32.xlu0 %v1189_v10, %s2720_s28 }
 0x25d   : > { %1309 = vrot.lane.b32.xlu1 %v1124_v18, %s2717_s27  ;;  %1162 = vrot.lane.b32.xlu0 %v1153_v21, %s2722_s16 }
 0x261   : > { %1166 = vrot.lane.b32.xlu1 %v1154_v15, %s2722_s16  ;;  %1097 = vrot.lane.b32.xlu0 %v1085_v33, %s2721_s14 }
 0x265   : > { %1130 = vrot.lane.b32.xlu0 %v1124_v18, %s2718_s29  ;;  %1093 = vrot.lane.b32.xlu1 %v1084_v35, %s2721_s14 }
 0x269   : > { %1126 = vrot.lane.b32.xlu0 %v1123_v20, %s2718_s29  ;;  %1204 = vrot.lane.b32.xlu1 %v1190_v39, %s2720_s28 }
 0x26d   : > { %1164 = vrot.lane.b32.xlu0 %v1159_v4, %s2722_s16  ;;  %1202 = vrot.lane.b32.xlu1 %v1196_v11, %s2720_s28 }
 0x271   : > { %1206 = vrot.lane.b32.xlu0 %v1197_v44, %s2720_s28  ;;  %1198 = vrot.lane.b32.xlu1 %v1195_v42, %s2720_s28 }
 0x275   : > { %1101 = vrot.lane.b32.xlu0 %v1086_v43, %s2721_s14  ;;  %1095 = vrot.lane.b32.xlu1 %v1090_v49, %s2721_s14 }
 0x279   : > { %1134 = vrot.lane.b32.xlu0 %v3185_v48, %s2718_s29  ;;  %1132 = vrot.lane.b32.xlu1 %v1081_v9, %s2718_s29  ;;  %v1091_v48 = vcombine.high %v1085_v33, %v1085_v33 }
 0x27d   : > { %1208 = vrot.lane.b32.xlu0 %v1191_v41, %s2720_s28  ;;  %1172 = vrot.lane.b32.xlu1 %v1161_v56, %s2722_s16 }
 0x281   : > { %1136 = vrot.lane.b32.xlu0 %v3165_v36, %s2718_s29  ;;  %1168 = vrot.lane.b32.xlu1 %v1160_v46, %s2722_s16  ;;  %v1646_v36 = vld [vmem:[#allocation3 + $0x18] sm:$0xf] }
 0x282   : > { %v1869_v38 = vcombine.low %v1646_v36, %v1646_v36 }
 0x285   : > { %1901 = vrot.lane.b32.xlu0 %v2932_v34, %s2716_s25  ;;  %1099 = vrot.lane.b32.xlu1 %v1091_v48, %s2721_s14 }
 0x289   : > { %1804 = vrot.lane.b32.xlu0 %v2932_v34, %s2714_s30  ;;  %1103 = vrot.lane.b32.xlu1 %v1092_v57, %s2721_s14 }
 0x28d   : > { %1876 = vrot.lane.b32.xlu0 %v3342_v55, %s2717_s27  ;;  %1840 = vrot.lane.b32.xlu1 %v2932_v34, %s2715_s15 }
 0x291   : > { %1806 = vrot.lane.b32.xlu0 %v1646_v36, %s2714_s30  ;;  %1903 = vrot.lane.b32.xlu1 %v1646_v36, %s2716_s25 }
 0x295   : > { %1880 = vrot.lane.b32.xlu0 %v1869_v38, %s2717_s27  ;;  %1878 = vrot.lane.b32.xlu1 %v2932_v34, %s2717_s27 }
 0x299   : > { %1733 = vrot.lane.b32.xlu0 %v3355_v60, %s2722_s16  ;;  %1842 = vrot.lane.b32.xlu1 %v1646_v36, %s2715_s15 }
 0x2bb   : > { %v1335_v62 = vpop.permute.xlu1 %1334  ;;  %v1337_v63 = vpop.permute.xlu0 %1336 }
 0x2bc   : > { %v1342_v2 = vrot.slane %v1335_v62, 4  ;;  %v1343_v19 = vrot.slane %v1337_v63, 4 }
 0x2be   : > { %v1345_v5 = vsel %vm446_vm14, %v1342_v2, %v1343_v19  ;;  %v1347_v50 = vsel %vm446_vm14, %v1343_v19, %v1344_v0 }
 0x2bf   : > { %v1346_v34 = vsel %vm444_vm12, %v1345_v5, %v1337_v63  ;;  %v1348_v51 = vsel %vm444_vm12, %v1347_v50, %v3247_v8  ;;  %v1274_v9 = vpop.permute.xlu1 %1273  ;;  %v1276_v12 = vpop.permute.xlu0 %1275 }
 0x2c0   : > { %v1353_v37 = vmul.f32 %v1346_v34, %v2920_v30  ;;  %v1354_v45 = vmul.f32 %v1348_v51, %v2922_v31  ;;  %v1281_v10 = vrot.slane %v1274_v9, 4  ;;  %v1282_v18 = vrot.slane %v1276_v12, 4 }
 0x2c2   : > { %v1358_v21 = vcombine.high %v1353_v37, %v1353_v37  ;;  %v1359_v15 = vcombine.high %v1354_v45, %v1354_v45  ;;  %1362 = vst [vmem:[#allocation4 + $0x58] sm:$0xf] %v1353_v37  ;;  %1364 = vst [vmem:[#allocation4 + $0x8] sm:$0xf] %v1354_v45  ;;  %v1284_v33 = vsel %vm446_vm14, %v1281_v10, %v1282_v18  ;;  %v3397_v45 = vld [vmem:[#allocation3 + $0x10] sm:$0xff] }
 0x2c3   : > { %v1286_v0 = vsel %vm446_vm14, %v1282_v18, %v1283_v26  ;;  %v1285_v8 = vsel %vm541_vm13, %v1284_v33, %v1276_v12  ;;  %v1238_v20 = vpop.permute.xlu1 %1237  ;;  %v1240_v39 = vpop.permute.xlu0 %1239 }
 0x2c4   : > { %v1287_v35 = vsel %vm541_vm13, %v1286_v0, %v3260_v58  ;;  %1363 = vst [vmem:[#allocation4 + $0x50] sm:$0xf] %v1358_v21  ;;  %1365 = vst [vmem:[#allocation4 + $0xa8] sm:$0xf] %v1359_v15  ;;  %v1292_v4 = vmul.f32 %v1285_v8, %v2912_v25  ;;  %v1245_v41 = vrot.slane %v1238_v20, 4  ;;  %v1246_v44 = vrot.slane %v1240_v39, 4 }
 0x2c5   : > { %v1293_v11 = vmul.f32 %v1287_v35, %v2918_v29 }
 0x2c6   : > { %v1297_v42 = vcombine.high %v1292_v4, %v1292_v4  ;;  %1301 = vst [vmem:[#allocation4 + $0xa0] sm:$0xf] %v1292_v4  ;;  %v1248_v26 = vsel %vm446_vm14, %v1245_v41, %v1246_v44  ;;  %v1250_v58 = vsel %vm446_vm14, %v1246_v44, %v1247_v22 }
 0x2c7   : > { %v1298_v43 = vcombine.high %v1293_v11, %v1293_v11  ;;  %1303 = vst [vmem:[#allocation4 + $0x30] sm:$0xf] %v1293_v11  ;;  %v1249_v49 = vsel %vm596_vm11, %v1248_v26, %v1240_v39  ;;  %v1251_v52 = vsel %vm596_vm11, %v1250_v58, %v3249_v3  ;;  %v1308_v56 = vpop.permute.xlu1 %1307  ;;  %v1312_v46 = vpop.permute.xlu0 %1311 }
 0x2c8   : > { %1302 = vst [vmem:[#allocation4 + $0x20] sm:$0xf] %v1297_v42  ;;  %v1256_v48 = vmul.f32 %v1249_v49, %v2920_v30  ;;  %v1257_v57 = vmul.f32 %v1251_v52, %v2922_v31  ;;  %v1321_v36 = vsel %vm740_vm15, %v1312_v46, %v3251_v14 }
 0x2c9   : > { %1304 = vst [vmem:[#allocation4 + $0x90] sm:$0xf] %v1298_v43  ;;  %1331 = vst [vmem:[#allocation4 + $0x30] sm:$0xf0] %v1321_v36  ;;  %v1387_v19 = vld [vmem:[#allocation4 + $0x58] sm:$0xf] }
 0x2ca   : > { %v1262_v38 = vcombine.low %v1256_v48, %v1256_v48  ;;  %v1263_v62 = vcombine.low %v1257_v57, %v1257_v57  ;;  %1269 = vst [vmem:[#allocation4 + $0x70] sm:$0xf0] %v1256_v48  ;;  %1271 = vst [vmem:[#allocation4 + $0x68] sm:$0xf0] %v1257_v57  ;;  %v1389_v5 = vld [vmem:[#allocation4 + $0x8] sm:$0xf] }
 0x2cb   : > { %v1129_v22 = vpop.permute.xlu1 %1128  ;;  %v1201_v63 = vpop.permute.xlu0 %1200  ;;  %v1388_v2 = vld [vmem:[#allocation4 + $0x50] sm:$0xf]  ;;  %v1390_v3 = vld [vmem:[#allocation4 + $0xa8] sm:$0xf] }
 0x2cc   : > { %1268 = vst [vmem:[#allocation4 + $0xb8] sm:$0xf0] %v1262_v38  ;;  %1270 = vst [vmem:[#allocation4 + $0x18] sm:$0xf0] %v1263_v62  ;;  %2356 = vmatprep.subr.msk.mxu1 %vm446_vm14, %v1388_v2  ;;  %2359 = vmatprep.subr.msk.mxu0 %vm446_vm14, %v1390_v3 }
 0x2cd   : > { %2357 = vmatpush1.msk.msra.mxu1 %vm446_vm14, %v1387_v19  ;;  %2360 = vmatpush1.msk.msra.mxu0 %vm446_vm14, %v1389_v5 }
 0x2cf   : > { %v1310_v14 = vpop.permute.xlu1 %1309  ;;  %v1163_v50 = vpop.permute.xlu0 %1162 }
 0x2d0   : > { %v1385_v34 = vld [vmem:[#allocation4 + $0x90] sm:$0xff]  ;;  %v1319_v51 = vsel %vm740_vm15, %v1308_v56, %v1310_v14  ;;  %v1320_v9 = vsel %vm740_vm15, %v1310_v14, %v1312_v46 }
 0x2d1   : > { %1502 = vmatprep.subr.mxu0 %v1385_v34  ;;  %v1384_v12 = vld [vmem:[#allocation4 + $0x30] sm:$0xff]  ;;  %1329 = vst [vmem:[#allocation4 + $0xa0] sm:$0xf0] %v1319_v51  ;;  %1330 = vst [vmem:[#allocation4 + $0x20] sm:$0xf0] %v1320_v9  ;;  %v1380_v37 = vld [vmem:[#allocation4 + $0x68] sm:$0xff] }
 0x2d2   : > { %1503 = vmatpush1.msra.mxu0 %v1384_v12  ;;  %1797 = vst [vmem:[#allocation4 + $0x68] sm:$0xf] %v3397_v45  ;;  %v1378_v20 = vld [vmem:[#allocation4 + $0x70] sm:$0xff] }
 0x2d3   : > { %1504 = vmatprep.subr.mxu0 %v1380_v37  ;;  %v3400_v10 = vpop.permute.xlu1 %1166  ;;  %v3402_v18 = vpop.permute.xlu0 %1097  ;;  %v1379_v21 = vld [vmem:[#allocation4 + $0x18] sm:$0xff] }
 0x2d4   : > { %1505 = vmatpush1.msra.mxu0 %v1379_v21  ;;  %v1377_v11 = vld [vmem:[#allocation4 + $0xb8] sm:$0xff] }
 0x2d7   : > { %v1094_v15 = vpop.permute.xlu1 %1093  ;;  %v1131_v33 = vpop.permute.xlu0 %1130 }
 0x2d8   : > { %v1139_v0 = vsel %vm509_vm0, %v1129_v22, %v1131_v33  ;;  %v1383_v8 = vld [vmem:[#allocation4 + $0x20] sm:$0xff] }
 0x2d9   : > { %v1382_v35 = vld [vmem:[#allocation4 + $0xa0] sm:$0xff]  ;;  %1149 = vst [vmem:[#allocation4] sm:$0xf0] %v1139_v0  ;;  %1431 = vmatprep.subr.mxu1 %v1383_v8 }
 0x2da   : > { %1432 = vmatpush1.msra.mxu1 %v1382_v35  ;;  %v1386_v35 = vld [vmem:[#allocation4 + $0x38] sm:$0xff] }
 0x2db   : > { %v1205_v39 = vpop.permute.xlu1 %1204  ;;  %1433 = vmatprep.subr.mxu1 %v1378_v20  ;;  %v1127_v4 = vpop.permute.xlu0 %1126 }
 0x2dc   : > { %v1138_v41 = vsel %vm509_vm0, %v1127_v4, %v1129_v22  ;;  %1434 = vmatpush1.msra.mxu1 %v1377_v11 }
 0x2dd   : > { %1148 = vst [vmem:[#allocation4 + $0xb0] sm:$0xf0] %v1138_v41 }
 0x2df   : > { %v1203_v44 = vpop.permute.xlu1 %1202  ;;  %v1165_v42 = vpop.permute.xlu0 %1164 }
 0x2e0   : > { %v1211_v43 = vsel %vm626_vm1, %v1201_v63, %v1203_v44  ;;  %v1212_v26 = vsel %vm626_vm1, %v1203_v44, %v1205_v39  ;;  %v1174_v58 = vsel %vm571_vm2, %v1163_v50, %v1165_v42  ;;  %v1175_v49 = vsel %vm571_vm2, %v1165_v42, %v3400_v10 }
 0x2e1   : > { %1221 = vst [vmem:[#allocation4 + $0x40] sm:$0xf0] %v1211_v43  ;;  %1222 = vst [vmem:[#allocation4 + $0x78] sm:$0xf0] %v1212_v26 }
 0x2e2   : > { %1184 = vst [vmem:[#allocation4 + $0x28] sm:$0xf] %v1174_v58  ;;  %1185 = vst [vmem:[#allocation4 + $0x40] sm:$0xf] %v1175_v49 }
 0x2e3   : > { %v1199_v52 = vpop.permute.xlu1 %1198  ;;  %v1207_v56 = vpop.permute.xlu0 %1206 }
 0x2e4   : > { %v1210_v46 = vsel %vm626_vm1, %v1199_v52, %v1201_v63  ;;  %v1213_v48 = vsel %vm626_vm1, %v1205_v39, %v1207_v56 }
 0x2e5   : > { %1220 = vst [vmem:[#allocation4 + $0x28] sm:$0xf0] %v1210_v46  ;;  %1223 = vst [vmem:[#allocation4 + $0x80] sm:$0xf0] %v1213_v48 }
 0x2e7   : > { %v1096_v57 = vpop.permute.xlu1 %1095  ;;  %v1102_v36 = vpop.permute.xlu0 %1101 }
 0x2e8   : > { %v1105_v38 = vsel %vm475_vm3, %v1094_v15, %v1096_v57  ;;  %v1106_v62 = vsel %vm475_vm3, %v1096_v57, %v3402_v18  ;;  %v1391_v15 = vld [vmem:[#allocation4 + $0xc0] sm:$0xf] }
 0x2e9   : > { %v1373_v22 = vld [vmem:[#allocation4 + $0x40] sm:$0xff]  ;;  %1115 = vst [vmem:[#allocation4 + $0xb0] sm:$0xf] %v1105_v38  ;;  %1116 = vst [vmem:[#allocation4] sm:$0xf] %v1106_v62 }
 0x2ea   : > { %1435 = vmatprep.subr.mxu1 %v1373_v22 }
 0x2eb   : > { %v1133_v2 = vpop.permute.xlu1 %1132  ;;  %v1135_v3 = vpop.permute.xlu0 %1134 }
 0x2ec   : > { %v1140_v19 = vsel %vm509_vm0, %v1131_v33, %v1133_v2  ;;  %v1141_v63 = vsel %vm509_vm0, %v1133_v2, %v1135_v3  ;;  %v1372_v5 = vld [vmem:[#allocation4 + $0x28] sm:$0xff] }
 0x2ed   : > { %1150 = vst [vmem:[#allocation4 + $0x10] sm:$0xf0] %v1140_v19  ;;  %1151 = vst [vmem:[#allocation4 + $0x48] sm:$0xf0] %v1141_v63  ;;  %1436 = vmatpush1.msra.mxu1 %v1372_v5 }
 0x2ef   : > { %v1173_v14 = vpop.permute.xlu1 %1172  ;;  %v1209_v50 = vpop.permute.xlu0 %1208 }
 0x2f0   : > { %v1178_v34 = vsel %vm571_vm2, %v3360_v28, %v1173_v14  ;;  %v1214_v51 = vsel %vm626_vm1, %v1207_v56, %v1209_v50  ;;  %v1368_v9 = vld [vmem:[#allocation4] sm:$0xff]  ;;  %v1367_v12 = vld [vmem:[#allocation4 + $0xb0] sm:$0xff] }
 0x2f1   : > { %1188 = vst [vmem:[#allocation4 + $0x88] sm:$0xf] %v1178_v34  ;;  %1224 = vst [vmem:[#allocation4 + $0x88] sm:$0xf0] %v1214_v51  ;;  %1437 = vmatprep.subr.mxu1 %v1368_v9 }
 0x2f2   : > { %1438 = vmatpush1.msra.mxu1 %v1367_v12 }
 0x2f3   : > { %v1169_v37 = vpop.permute.xlu1 %1168  ;;  %2358 = vmatmul.mubr.msk.f32.vlgmr.msra.gmra.mxu1 %vm814_vm4, %v3222_v40  ;;  %2410 = vmatprep.subr.mxu1 %v2713_v1  ;;  %v1137_v21 = vpop.permute.xlu0 %1136 }
 0x2f4   : > { %v1176_v33 = vsel %vm571_vm2, %v3400_v10, %v1169_v37  ;;  %v1177_v0 = vsel %vm571_vm2, %v1169_v37, %v3360_v28  ;;  %v1142_v8 = vsel %vm509_vm0, %v1135_v3, %v1137_v21  ;;  %2411 = vmatpush3.msk.msra.mxu1 %vm446_vm14, %v1391_v15  ;;  %2420 = vmatprep.mubr.msk.f32.mxu1 %vm2723_vm5, %v2713_v1 }
 0x2f5   : > { %1186 = vst [vmem:[#allocation4 + $0x78] sm:$0xf] %v1176_v33  ;;  %1187 = vst [vmem:[#allocation4 + $0x80] sm:$0xf] %v1177_v0  ;;  %2412 = vmatprep.subr.mxu1 %v2713_v1 }
 0x2f6   : > { %1152 = vst [vmem:[#allocation4 + $0x60] sm:$0xf0] %v1142_v8  ;;  %2413 = vmatpush3.msra.mxu1 %v1386_v35 }
 0x2f7   : > { %v1100_v20 = vpop.permute.xlu1 %1099  ;;  %2414 = vmatprep.subr.mxu1 %v2713_v1  ;;  %v3434_v10 = vpop.permute.xlu0 %1901 }
 0x2f8   : > { %v1107_v28 = vsel %vm475_vm3, %v3402_v18, %v1100_v20  ;;  %v1108_v39 = vsel %vm475_vm3, %v1100_v20, %v1102_v36  ;;  %2415 = vmatpush3.msra.mxu1 %v3325_v53  ;;  %v1376_v4 = vld [vmem:[#allocation4 + $0x88] sm:$0xff] }
 0x2f9   : > { %1117 = vst [vmem:[#allocation4 + $0x10] sm:$0xf] %v1107_v28  ;;  %1118 = vst [vmem:[#allocation4 + $0x48] sm:$0xf] %v1108_v39  ;;  %2416 = vmatprep.subr.mxu1 %v2713_v1 }
 0x2fa   : > { %2417 = vmatpush3.msra.mxu1 %v1376_v4 }
 0x2fb   : > { %v1104_v11 = vpop.permute.xlu1 %1103  ;;  %v3441_v41 = vpop.permute.xlu0 %1804  ;;  %2418 = vmatprep.subr.mxu1 %v2713_v1 }
 0x2fc   : > { %v1109_v44 = vsel %vm475_vm3, %v1102_v36, %v1104_v11  ;;  %v1375_v42 = vld [vmem:[#allocation4 + $0x80] sm:$0xff]  ;;  %v1374_v43 = vld [vmem:[#allocation4 + $0x78] sm:$0xff]  ;;  %v1810_v53 = vrot.slane %v3441_v41, 4  ;;  %v1907_v36 = vrot.slane %v3434_v10, 4 }
 0x2fd   : > { %1119 = vst [vmem:[#allocation4 + $0x60] sm:$0xf] %v1109_v44  ;;  %1506 = vmatprep.subr.mxu0 %v1375_v42 }
 0x2fe   : > { %1507 = vmatpush1.msra.mxu0 %v1374_v43 }
 0x2ff   : > { %v3445_v18 = vpop.permute.xlu0 %1876  ;;  %v3458_v57 = vpop.permute.xlu1 %1840 }
 0x300   : > { %v1370_v26 = vld [vmem:[#allocation4 + $0x48] sm:$0xff]  ;;  %v1369_v58 = vld [vmem:[#allocation4 + $0x10] sm:$0xff] }
 0x301   : > { %1508 = vmatprep.subr.mxu0 %v1370_v26 }
 0x302   : > { %1509 = vmatpush1.msra.mxu0 %v1369_v58 }
 0x303   : > { %2361 = vmatmul.mubr.msk.f32.vlgmr.msra.gmra.mxu0 %vm814_vm4, %v3222_v40  ;;  %v1807_v49 = vpop.permute.xlu0 %1806  ;;  %v1904_v38 = vpop.permute.xlu1 %1903 }
 0x304   : > { %v1815_v52 = vsel %vm596_vm11, %v1810_v53, %v1807_v49  ;;  %v1371_v56 = vld [vmem:[#allocation4 + $0x60] sm:$0xff]  ;;  %2034 = vmatprep.mubr.f32.mxu0 %v2713_v1  ;;  %v1912_v62 = vsel %vm444_vm12, %v1907_v36, %v1904_v38 }
 0x305   : > { %v1821_v46 = vmul.f32 %v2900_v17, %v1815_v52  ;;  %2419 = vmatpush3.msra.mxu1 %v1371_v56  ;;  %v1918_v22 = vmul.f32 %v2900_v17, %v1912_v62 }
 0x306   : > { %2421 = vmatmul.mubr.msk.f32.vlgmr.msra.gmra.mxu1 %vm814_vm4, %v3222_v40  ;;  %v1846_v40 = vrot.slane %v3458_v57, 4 }
 0x307   : > { %v1827_v48 = vcombine.low %v1821_v46, %v1821_v46  ;;  %2105 = vmatprep.mubr.f32.mxu1 %v2713_v1  ;;  %v1881_v2 = vpop.permute.xlu0 %1880  ;;  %1929 = vst [vmem:[#allocation4 + $0xc0] sm:$0xf] %v1918_v22  ;;  %v1879_v3 = vpop.permute.xlu1 %1878 }
 0x308   : > { %v1885_v19 = vsel %vm740_vm15, %v3445_v18, %v1879_v3  ;;  %v1886_v63 = vsel %vm740_vm15, %v1879_v3, %v1881_v2 }
 0x309   : > { %1835 = vst [vmem:[#allocation4 + $0x98] sm:$0xf0] %v1827_v48  ;;  %1895 = vst [vmem:[#allocation4 + $0x90] sm:$0xf0] %v1885_v19 }
 0x30a   : > { %1896 = vst [vmem:[#allocation4 + $0x38] sm:$0xf0] %v1886_v63 }
 0x30b   : > { %v1843_v5 = vpop.permute.xlu1 %1842 }
 0x30c   : > { %v1851_v14 = vsel %vm541_vm13, %v1846_v40, %v1843_v5 }
 0x30d   : > { %v1857_v50 = vmul.f32 %v2897_v16, %v1851_v14 }
 0x30f   : > { %1868 = vst [vmem:[#allocation4 + $0x38] sm:$0xf] %v1857_v50 }
 0x3b3   : > { %v1473_v17 = vpop.f32.mrf.mxu1 }
 0x3b4   : > { %v1618_v34 = vadd.f32 %v1473_v17, %v3267_v47 }
 0x3b5   : > { %v1475_v51 = vpop.f32.mrf.mxu1 }
 0x3b6   : > { %v1619_v9 = vadd.f32 %v1475_v51, %v3267_v47  ;;  %2559 = vtanh.f32 %v1618_v34 }
 0x3b8   : > { %2561 = vtanh.f32 %v1619_v9 }
 0x3c3   : > { %v1544_v12 = vpop.f32.mrf.mxu0  ;;  %v2560_v37 = vpop.eup %2559 }
 0x3c4   : > { %v1624_v35 = vand.u32 2147483647, %v2560_v37 }
 0x3c5   : > { %v1545_v21 = vpop.f32.mrf.mxu0  ;;  %v2562_v15 = vpop.eup %2561 }
 0x3c6   : > { %v1620_v33 = vadd.f32 %v1545_v21, %v3258_v13  ;;  %v1614_v0 = vpop.f32.mrf.mxu1  ;;  %v1625_v28 = vand.u32 2147483647, %v2562_v15 }
 0x3c7   : > { %v1621_v8 = vadd.f32 %v1614_v0, %v3258_v13 }
 0x3c8   : > { %v1628_v16 = vrot.slane %v1620_v33, 4  ;;  %v2422_v20 = vpop.f32.mrf.mxu1 }
 0x3c9   : > { %v1629_v39 = vrot.slane %v1621_v8, 4 }
 0x3ca   : > { %v1632_v4 = vmul.f32 %v1628_v16, %v1624_v35 }
 0x3cb   : > { %v1633_v11 = vmul.f32 %v1629_v39, %v1625_v28 }
 0x3cd   : > { %v1636_v44 = vcombine.high %v1632_v4, %v1633_v11 }
 0x3cf   : > { %v3478_v42 = vadd.f32 %v1636_v44, %v3282_v27 }
 0x3d1   : > { %v1640_v43 = vsub.f32 %v3478_v42, %v3397_v45 }
 0x3d3   : > { %1641 = vst [vmem:[#allocation3 + $0x4] sm:$0xff] %v1640_v43 }
 0x3da   : > { %v1644_v26 = vld [vmem:[#allocation3 + $0x8] sm:$0xff]  ;;  %v1643_v58 = vld [vmem:[#allocation3] sm:$0xff] }
 0x3db   : > { %1899 = vrot.lane.b32.xlu0 %v1644_v26, %s2716_s25  ;;  %1795 = vst [vmem:[#allocation4 + $0x70] sm:$0xf] %v1644_v26  ;;  %1897 = vrot.lane.b32.xlu1 %v1643_v58, %s2716_s25  ;;  %v1789_v49 = vcombine.high %v1644_v26, %v1644_v26  ;;  %v1788_v52 = vcombine.high %v1643_v58, %v1643_v58  ;;  %s2378_s25 = sshll.u32 %s2701_s21, 7  ;;  %s2629_s21 = sshll.u32 %s2724_s0, 4  ;;  %s2630_s21 = int_to_ptr.vmem [resolvable:$false] %s2629_s21 }
 0x3dc   : > { %v1752_v27 = vmul.f32 %v1643_v58, %v2999_v59  ;;  %v1687_v56 = vcombine.low %v1644_v26, %v1644_v26  ;;  %v1716_v46 = vmul.f32 %v1643_v58, %v3014_v6  ;;  %v1717_v48 = vmul.f32 %v1644_v26, %v3033_v32 }
 0x3dd   : > { %1796 = vst [vmem:[#allocation4 + $0x18] sm:$0xf] %v1789_v49  ;;  %1794 = vst [vmem:[#allocation4 + $0xb8] sm:$0xf] %v1788_v52  ;;  %v1648_v38 = vmul.f32 %v1644_v26, %v3028_v24  ;;  %v1647_v59 = vmul.f32 %v1643_v58, %v3004_v61  ;;  %v1686_v62 = vcombine.low %v1643_v58, %v1643_v58 }
 0x3de   : > { %v1753_v6 = vmul.f32 %v1644_v26, %v3069_v54  ;;  %v1722_v32 = vcombine.high %v1716_v46, %v1716_v46  ;;  %v1754_v24 = vmul.f32 %v3397_v45, %v3112_v23  ;;  %v1758_v2 = vcombine.low %v1752_v27, %v1752_v27 }
 0x3df   : > { %1838 = vrot.lane.b32.xlu0 %v1644_v26, %s2715_s15  ;;  %1836 = vrot.lane.b32.xlu1 %v1643_v58, %s2715_s15  ;;  %v1649_v54 = vmul.f32 %v3397_v45, %v3091_v7  ;;  %v1653_v3 = vcombine.high %v1647_v59, %v1647_v59  ;;  %v1724_v23 = vcombine.high %v3355_v60, %v3355_v60 }
 0x3e0   : > { %v1759_v22 = vcombine.low %v1753_v6, %v1753_v6  ;;  %v1760_v61 = vcombine.low %v1754_v24, %v1754_v24  ;;  %v1723_v19 = vcombine.high %v1717_v48, %v1717_v48  ;;  %v1654_v7 = vcombine.high %v1648_v38, %v1648_v38 }
 0x3e1   : > { %v1655_v63 = vcombine.high %v1649_v54, %v1649_v54 }
 0x3e3   : > { %1802 = vrot.lane.b32.xlu0 %v1644_v26, %s2714_s30  ;;  %1800 = vrot.lane.b32.xlu1 %v1643_v58, %s2714_s30 }
 0x3e7   : > { %1874 = vrot.lane.b32.xlu0 %v1644_v26, %s2717_s27  ;;  %1870 = vrot.lane.b32.xlu1 %v1643_v58, %s2717_s27 }
 0x3eb   : > { %1691 = vrot.lane.b32.xlu1 %v1643_v58, %s2718_s29  ;;  %1763 = vrot.lane.b32.xlu0 %v1752_v27, %s2720_s28 }
 0x3ef   : > { %1872 = vrot.lane.b32.xlu1 %v1687_v56, %s2717_s27  ;;  %1725 = vrot.lane.b32.xlu0 %v1716_v46, %s2722_s16  ;;  %s294_s27 = scalar_lea.vmem [#allocation10], %s2332_s11  ;;  %s2631_s11 = scalar_lea.vmem %s2630_s21, 256 }
 0x3f3   : > { %1729 = vrot.lane.b32.xlu1 %v1717_v48, %s2722_s16  ;;  %1660 = vrot.lane.b32.xlu0 %v1648_v38, %s2721_s14 }
 0x3f7   : > { %1693 = vrot.lane.b32.xlu0 %v1687_v56, %s2718_s29  ;;  %1656 = vrot.lane.b32.xlu1 %v1647_v59, %s2721_s14 }
 0x3fb   : > { %1689 = vrot.lane.b32.xlu0 %v1686_v62, %s2718_s29  ;;  %1767 = vrot.lane.b32.xlu1 %v1753_v6, %s2720_s28 }
 0x3ff   : > { %1727 = vrot.lane.b32.xlu0 %v1722_v32, %s2722_s16  ;;  %1765 = vrot.lane.b32.xlu1 %v1759_v22, %s2720_s28 }
 0x403   : > { %1769 = vrot.lane.b32.xlu0 %v1760_v61, %s2720_s28  ;;  %1761 = vrot.lane.b32.xlu1 %v1758_v2, %s2720_s28 }
 0x407   : > { %1664 = vrot.lane.b32.xlu0 %v1649_v54, %s2721_s14  ;;  %1658 = vrot.lane.b32.xlu1 %v1653_v3, %s2721_s14 }
 0x40b   : > { %1697 = vrot.lane.b32.xlu0 %v3342_v55, %s2718_s29  ;;  %1695 = vrot.lane.b32.xlu1 %v1644_v26, %s2718_s29  ;;  %v3528_v55 = vpop.permute.xlu0 %1733 }
 0x40f   : > { %1771 = vrot.lane.b32.xlu0 %v1754_v24, %s2720_s28  ;;  %1735 = vrot.lane.b32.xlu1 %v1724_v23, %s2722_s16 }
 0x413   : > { %1699 = vrot.lane.b32.xlu0 %v3397_v45, %s2718_s29  ;;  %1731 = vrot.lane.b32.xlu1 %v1723_v19, %s2722_s16  ;;  %s2219_s29 = sshll.u32 %s294_s27, 4  ;;  %s2217_s16 = scalar_lea.hbm %s3661_s5, %s2378_s25  ;;  %s2220_s29 = int_to_ptr.vmem [resolvable:$true] %s2219_s29 }
 0x414   : > { %s2625_s12 = scalar_lea.vmem %s2220_s29, 128  ;;  %p2632_p13 = scmp.lt.s32.totalorder %s2220_s29, %s2630_s21 }
 0x415   : > { %p2626_p8 = scmp.ne.s32.totalorder %s2220_s29, %s2625_s12  ;;  %p2633_p5 = scmp.lt.s32.totalorder %s2631_s11, %s2625_s12 }
 0x417   : > { %1662 = vrot.lane.b32.xlu1 %v1654_v7, %s2721_s14  ;;  %p2627_p0 = pnand %p2626_p8, %p2806_p9  ;;  %p2634_p12 = por %p2633_p5, %p2632_p13 }
 0x419   : > { %p2628_p3 = pneg %p2627_p0 }
 0x41b   : > { %1666 = vrot.lane.b32.xlu1 %v1655_v63, %s2721_s14  ;;  %p2635_p6 = pnand %p2634_p12, %p2628_p3 }
 0x44d   : > { %v1898_v5 = vpop.permute.xlu1 %1897  ;;  %v1900_v60 = vpop.permute.xlu0 %1899 }
 0x44e   : > { %v1905_v14 = vrot.slane %v1898_v5, 4  ;;  %v1906_v50 = vrot.slane %v1900_v60, 4 }
 0x450   : > { %v1908_v17 = vsel %vm446_vm14, %v1905_v14, %v1906_v50  ;;  %v1910_v45 = vsel %vm446_vm14, %v1906_v50, %v1907_v36 }
 0x451   : > { %v1909_v34 = vsel %vm444_vm12, %v1908_v17, %v1900_v60  ;;  %v1911_v51 = vsel %vm444_vm12, %v1910_v45, %v3434_v10  ;;  %v1837_v9 = vpop.permute.xlu1 %1836  ;;  %v1839_v12 = vpop.permute.xlu0 %1838 }
 0x452   : > { %v1916_v37 = vmul.f32 %v1909_v34, %v2920_v30  ;;  %v1917_v21 = vmul.f32 %v1911_v51, %v2922_v31  ;;  %v1844_v15 = vrot.slane %v1837_v9, 4  ;;  %v1845_v33 = vrot.slane %v1839_v12, 4 }
 0x454   : > { %v1921_v0 = vcombine.high %v1916_v37, %v1916_v37  ;;  %v1922_v8 = vcombine.high %v1917_v21, %v1917_v21  ;;  %1925 = vst [vmem:[#allocation4 + $0x58] sm:$0xf] %v1916_v37  ;;  %1927 = vst [vmem:[#allocation4 + $0x8] sm:$0xf] %v1917_v21  ;;  %v1847_v35 = vsel %vm446_vm14, %v1844_v15, %v1845_v33 }
 0x455   : > { %v1849_v36 = vsel %vm446_vm14, %v1845_v33, %v1846_v40  ;;  %v1848_v10 = vsel %vm541_vm13, %v1847_v35, %v1839_v12  ;;  %v1801_v20 = vpop.permute.xlu1 %1800  ;;  %v1803_v28 = vpop.permute.xlu0 %1802 }
 0x456   : > { %v1850_v16 = vsel %vm541_vm13, %v1849_v36, %v3458_v57  ;;  %1926 = vst [vmem:[#allocation4 + $0x50] sm:$0xf] %v1921_v0  ;;  %1928 = vst [vmem:[#allocation4 + $0xa8] sm:$0xf] %v1922_v8  ;;  %v1855_v39 = vmul.f32 %v1848_v10, %v2912_v25  ;;  %v1808_v11 = vrot.slane %v1801_v20, 4  ;;  %v1809_v44 = vrot.slane %v1803_v28, 4 }
 0x457   : > { %v1856_v4 = vmul.f32 %v1850_v16, %v2918_v29 }
 0x458   : > { %v1860_v43 = vcombine.high %v1855_v39, %v1855_v39  ;;  %1864 = vst [vmem:[#allocation4 + $0xa0] sm:$0xf] %v1855_v39  ;;  %v1811_v40 = vsel %vm446_vm14, %v1808_v11, %v1809_v44  ;;  %v1813_v57 = vsel %vm446_vm14, %v1809_v44, %v1810_v53 }
 0x459   : > { %v1861_v26 = vcombine.high %v1856_v4, %v1856_v4  ;;  %1866 = vst [vmem:[#allocation4 + $0x30] sm:$0xf] %v1856_v4  ;;  %v1812_v58 = vsel %vm596_vm11, %v1811_v40, %v1803_v28  ;;  %v1814_v49 = vsel %vm596_vm11, %v1813_v57, %v3441_v41  ;;  %v1871_v25 = vpop.permute.xlu1 %1870  ;;  %v1875_v52 = vpop.permute.xlu0 %1874 }
 0x45a   : > { %1865 = vst [vmem:[#allocation4 + $0x20] sm:$0xf] %v1860_v43  ;;  %v1819_v29 = vmul.f32 %v1812_v58, %v2920_v30  ;;  %v1820_v27 = vmul.f32 %v1814_v49, %v2922_v31  ;;  %v1884_v56 = vsel %vm740_vm15, %v1875_v52, %v3445_v18 }
 0x45b   : > { %1867 = vst [vmem:[#allocation4 + $0x90] sm:$0xf] %v1861_v26  ;;  %1894 = vst [vmem:[#allocation4 + $0x30] sm:$0xf0] %v1884_v56  ;;  %v1950_v30 = vld [vmem:[#allocation4 + $0x58] sm:$0xf] }
 0x45c   : > { %v1825_v46 = vcombine.low %v1819_v29, %v1819_v29  ;;  %v1826_v48 = vcombine.low %v1820_v27, %v1820_v27  ;;  %1832 = vst [vmem:[#allocation4 + $0x70] sm:$0xf0] %v1819_v29  ;;  %1834 = vst [vmem:[#allocation4 + $0x68] sm:$0xf0] %v1820_v27  ;;  %v1952_v31 = vld [vmem:[#allocation4 + $0x8] sm:$0xf] }
 0x45d   : > { %v1692_v53 = vpop.permute.xlu1 %1691  ;;  %v1764_v38 = vpop.permute.xlu0 %1763  ;;  %v1951_v59 = vld [vmem:[#allocation4 + $0x50] sm:$0xf]  ;;  %v1953_v41 = vld [vmem:[#allocation4 + $0xa8] sm:$0xf]  ;;  %v1954_v27 = vld [vmem:[#allocation4 + $0xc0] sm:$0xf] }
 0x45e   : > { %1831 = vst [vmem:[#allocation4 + $0xb8] sm:$0xf0] %v1825_v46  ;;  %1833 = vst [vmem:[#allocation4 + $0x18] sm:$0xf0] %v1826_v48  ;;  %2364 = vmatprep.subr.msk.mxu0 %vm446_vm14, %v1951_v59  ;;  %2367 = vmatprep.subr.msk.mxu1 %vm446_vm14, %v1953_v41  ;;  %v1944_v59 = vld [vmem:[#allocation4 + $0x98] sm:$0xff] }
 0x45f   : > { %2365 = vmatpush1.msk.msra.mxu0 %vm446_vm14, %v1950_v30  ;;  %2368 = vmatpush1.msk.msra.mxu1 %vm446_vm14, %v1952_v31 }
 0x461   : > { %v1873_v18 = vpop.permute.xlu1 %1872  ;;  %v1726_v62 = vpop.permute.xlu0 %1725 }
 0x462   : > { %v1948_v6 = vld [vmem:[#allocation4 + $0x90] sm:$0xff]  ;;  %v1882_v32 = vsel %vm740_vm15, %v1871_v25, %v1873_v18  ;;  %v1883_v22 = vsel %vm740_vm15, %v1873_v18, %v1875_v52  ;;  %v2568_v52 = vld [vmem:[%s3658_s2] sm:$0xff] }
 0x463   : > { %2065 = vmatprep.subr.mxu1 %v1948_v6  ;;  %v1947_v24 = vld [vmem:[#allocation4 + $0x30] sm:$0xff]  ;;  %1892 = vst [vmem:[#allocation4 + $0xa0] sm:$0xf0] %v1882_v32  ;;  %1893 = vst [vmem:[#allocation4 + $0x20] sm:$0xf0] %v1883_v22  ;;  %v1943_v61 = vld [vmem:[#allocation4 + $0x68] sm:$0xff] }
 0x464   : > { %2066 = vmatpush1.msra.mxu1 %v1947_v24  ;;  %v1941_v60 = vld [vmem:[#allocation4 + $0x70] sm:$0xff] }
 0x465   : > { %2067 = vmatprep.subr.mxu1 %v1943_v61  ;;  %v3565_v2 = vpop.permute.xlu1 %1729  ;;  %v3567_v54 = vpop.permute.xlu0 %1660  ;;  %v1942_v3 = vld [vmem:[#allocation4 + $0x18] sm:$0xff] }
 0x466   : > { %2068 = vmatpush1.msra.mxu1 %v1942_v3  ;;  %v1940_v17 = vld [vmem:[#allocation4 + $0xb8] sm:$0xff] }
 0x469   : > { %v1657_v23 = vpop.permute.xlu1 %1656  ;;  %v1694_v19 = vpop.permute.xlu0 %1693 }
 0x46a   : > { %v1702_v7 = vsel %vm509_vm0, %v1692_v53, %v1694_v19  ;;  %v1946_v63 = vld [vmem:[#allocation4 + $0x20] sm:$0xff] }
 0x46b   : > { %v1945_v5 = vld [vmem:[#allocation4 + $0xa0] sm:$0xff]  ;;  %1712 = vst [vmem:[#allocation4] sm:$0xf0] %v1702_v7  ;;  %1994 = vmatprep.subr.mxu0 %v1946_v63 }
 0x46c   : > { %1995 = vmatpush1.msra.mxu0 %v1945_v5 }
 0x46d   : > { %v1768_v14 = vpop.permute.xlu1 %1767  ;;  %1996 = vmatprep.subr.mxu0 %v1941_v60  ;;  %v1690_v50 = vpop.permute.xlu0 %1689 }
 0x46e   : > { %v1701_v45 = vsel %vm509_vm0, %v1690_v50, %v1692_v53  ;;  %1997 = vmatpush1.msra.mxu0 %v1940_v17  ;;  %v1949_v53 = vld [vmem:[#allocation4 + $0x38] sm:$0xff] }
 0x46f   : > { %1711 = vst [vmem:[#allocation4 + $0xb0] sm:$0xf0] %v1701_v45 }
 0x471   : > { %v1766_v34 = vpop.permute.xlu1 %1765  ;;  %v1728_v51 = vpop.permute.xlu0 %1727 }
 0x472   : > { %v1774_v9 = vsel %vm626_vm1, %v1764_v38, %v1766_v34  ;;  %v1775_v12 = vsel %vm626_vm1, %v1766_v34, %v1768_v14  ;;  %v1737_v37 = vsel %vm571_vm2, %v1726_v62, %v1728_v51  ;;  %v1738_v21 = vsel %vm571_vm2, %v1728_v51, %v3565_v2 }
 0x473   : > { %1784 = vst [vmem:[#allocation4 + $0x40] sm:$0xf0] %v1774_v9  ;;  %1785 = vst [vmem:[#allocation4 + $0x78] sm:$0xf0] %v1775_v12 }
 0x474   : > { %1747 = vst [vmem:[#allocation4 + $0x28] sm:$0xf] %v1737_v37  ;;  %1748 = vst [vmem:[#allocation4 + $0x40] sm:$0xf] %v1738_v21 }
 0x475   : > { %v1762_v15 = vpop.permute.xlu1 %1761  ;;  %v1770_v33 = vpop.permute.xlu0 %1769 }
 0x476   : > { %v1773_v0 = vsel %vm626_vm1, %v1762_v15, %v1764_v38  ;;  %v1776_v8 = vsel %vm626_vm1, %v1768_v14, %v1770_v33 }
 0x477   : > { %1783 = vst [vmem:[#allocation4 + $0x28] sm:$0xf0] %v1773_v0  ;;  %1786 = vst [vmem:[#allocation4 + $0x80] sm:$0xf0] %v1776_v8 }
 0x479   : > { %v1659_v35 = vpop.permute.xlu1 %1658  ;;  %v1665_v36 = vpop.permute.xlu0 %1664 }
 0x47a   : > { %v1668_v10 = vsel %vm475_vm3, %v1657_v23, %v1659_v35  ;;  %v1669_v16 = vsel %vm475_vm3, %v1659_v35, %v3567_v54 }
 0x47b   : > { %v1936_v20 = vld [vmem:[#allocation4 + $0x40] sm:$0xff]  ;;  %1678 = vst [vmem:[#allocation4 + $0xb0] sm:$0xf] %v1668_v10  ;;  %1679 = vst [vmem:[#allocation4] sm:$0xf] %v1669_v16 }
 0x47c   : > { %1998 = vmatprep.subr.mxu0 %v1936_v20 }
 0x47d   : > { %v1696_v28 = vpop.permute.xlu1 %1695  ;;  %v1698_v39 = vpop.permute.xlu0 %1697 }
 0x47e   : > { %v1703_v4 = vsel %vm509_vm0, %v1694_v19, %v1696_v28  ;;  %v1704_v11 = vsel %vm509_vm0, %v1696_v28, %v1698_v39  ;;  %v1935_v44 = vld [vmem:[#allocation4 + $0x28] sm:$0xff] }
 0x47f   : > { %1713 = vst [vmem:[#allocation4 + $0x10] sm:$0xf0] %v1703_v4  ;;  %1714 = vst [vmem:[#allocation4 + $0x48] sm:$0xf0] %v1704_v11  ;;  %1999 = vmatpush1.msra.mxu0 %v1935_v44 }
 0x481   : > { %v1736_v43 = vpop.permute.xlu1 %1735  ;;  %v1772_v26 = vpop.permute.xlu0 %1771 }
 0x482   : > { %v1741_v40 = vsel %vm571_vm2, %v3528_v55, %v1736_v43  ;;  %v1777_v57 = vsel %vm626_vm1, %v1770_v33, %v1772_v26  ;;  %v1931_v58 = vld [vmem:[#allocation4] sm:$0xff]  ;;  %v1930_v49 = vld [vmem:[#allocation4 + $0xb0] sm:$0xff] }
 0x483   : > { %1751 = vst [vmem:[#allocation4 + $0x88] sm:$0xf] %v1741_v40  ;;  %1787 = vst [vmem:[#allocation4 + $0x88] sm:$0xf0] %v1777_v57  ;;  %2000 = vmatprep.subr.mxu0 %v1931_v58 }
 0x484   : > { %2001 = vmatpush1.msra.mxu0 %v1930_v49 }
 0x485   : > { %v1732_v25 = vpop.permute.xlu1 %1731  ;;  %2366 = vmatmul.mubr.msk.f32.vlgmr.msra.gmra.mxu0 %vm814_vm4, %v2568_v52  ;;  %2423 = vmatprep.subr.mxu0 %v2713_v1  ;;  %v1700_v29 = vpop.permute.xlu0 %1699 }
 0x486   : > { %v1739_v56 = vsel %vm571_vm2, %v3565_v2, %v1732_v25  ;;  %v1740_v46 = vsel %vm571_vm2, %v1732_v25, %v3528_v55  ;;  %v1705_v48 = vsel %vm509_vm0, %v1698_v39, %v1700_v29  ;;  %2424 = vmatpush3.msk.msra.mxu0 %vm446_vm14, %v1954_v27  ;;  %2433 = vmatprep.mubr.msk.f32.mxu0 %vm2723_vm5, %v2713_v1 }
 0x487   : > { %1749 = vst [vmem:[#allocation4 + $0x78] sm:$0xf] %v1739_v56  ;;  %1750 = vst [vmem:[#allocation4 + $0x80] sm:$0xf] %v1740_v46  ;;  %2425 = vmatprep.subr.mxu0 %v2713_v1 }
 0x488   : > { %1715 = vst [vmem:[#allocation4 + $0x60] sm:$0xf0] %v1705_v48  ;;  %2426 = vmatpush3.msra.mxu0 %v1949_v53 }
 0x489   : > { %v1663_v38 = vpop.permute.xlu1 %1662  ;;  %2427 = vmatprep.subr.mxu0 %v2713_v1 }
 0x48a   : > { %v1670_v55 = vsel %vm475_vm3, %v3567_v54, %v1663_v38  ;;  %v1671_v41 = vsel %vm475_vm3, %v1663_v38, %v1665_v36  ;;  %2428 = vmatpush3.msra.mxu0 %v1944_v59  ;;  %v1939_v30 = vld [vmem:[#allocation4 + $0x88] sm:$0xff] }
 0x48b   : > { %1680 = vst [vmem:[#allocation4 + $0x10] sm:$0xf] %v1670_v55  ;;  %1681 = vst [vmem:[#allocation4 + $0x48] sm:$0xf] %v1671_v41  ;;  %2429 = vmatprep.subr.mxu0 %v2713_v1 }
 0x48c   : > { %2430 = vmatpush3.msra.mxu0 %v1939_v30 }
 0x48d   : > { %v1667_v31 = vpop.permute.xlu1 %1666  ;;  %2431 = vmatprep.subr.mxu0 %v2713_v1 }
 0x48e   : > { %v1672_v18 = vsel %vm475_vm3, %v1665_v36, %v1667_v31  ;;  %v1938_v62 = vld [vmem:[#allocation4 + $0x80] sm:$0xff]  ;;  %v1937_v6 = vld [vmem:[#allocation4 + $0x78] sm:$0xff] }
 0x48f   : > { %1682 = vst [vmem:[#allocation4 + $0x60] sm:$0xf] %v1672_v18  ;;  %2069 = vmatprep.subr.mxu1 %v1938_v62 }
 0x490   : > { %2070 = vmatpush1.msra.mxu1 %v1937_v6 }
 0x492   : > { %v1933_v32 = vld [vmem:[#allocation4 + $0x48] sm:$0xff]  ;;  %v1932_v22 = vld [vmem:[#allocation4 + $0x10] sm:$0xff] }
 0x493   : > { %2071 = vmatprep.subr.mxu1 %v1933_v32 }
 0x494   : > { %2072 = vmatpush1.msra.mxu1 %v1932_v22 }
 0x495   : > { %2369 = vmatmul.mubr.msk.f32.vlgmr.msra.gmra.mxu1 %vm814_vm4, %v2568_v52 }
 0x496   : > { %v1934_v24 = vld [vmem:[#allocation4 + $0x60] sm:$0xff] }
 0x497   : > { %2432 = vmatpush3.msra.mxu0 %v1934_v24 }
 0x498   : > { %2434 = vmatmul.mubr.msk.f32.vlgmr.msra.gmra.mxu0 %vm814_vm4, %v2568_v52 }
 0x545   : > { %v2036_v61 = vpop.f32.mrf.mxu0 }
 0x546   : > { %v2181_v1 = vadd.f32 %v2036_v61, %v3267_v47 }
 0x547   : > { %v2038_v2 = vpop.f32.mrf.mxu0 }
 0x548   : > { %v2182_v54 = vadd.f32 %v2038_v2, %v3267_v47  ;;  %2563 = vtanh.f32 %v2181_v1 }
 0x54a   : > { %2565 = vtanh.f32 %v2182_v54 }
 0x555   : > { %v2107_v3 = vpop.f32.mrf.mxu1  ;;  %v2564_v23 = vpop.eup %2563 }
 0x556   : > { %v2187_v14 = vand.u32 2147483647, %v2564_v23 }
 0x557   : > { %v2108_v19 = vpop.f32.mrf.mxu1  ;;  %v2566_v7 = vpop.eup %2565 }
 0x558   : > { %v2183_v63 = vadd.f32 %v2108_v19, %v3258_v13  ;;  %v2177_v5 = vpop.f32.mrf.mxu0  ;;  %v2188_v45 = vand.u32 2147483647, %v2566_v7 }
 0x559   : > { %v2184_v60 = vadd.f32 %v2177_v5, %v3258_v13 }
 0x55a   : > { %v2191_v50 = vrot.slane %v2183_v63, 4  ;;  %v2435_v17 = vpop.f32.mrf.mxu0 }
 0x55b   : > { %v2192_v47 = vrot.slane %v2184_v60, 4 }
 0x55c   : > { %v2195_v34 = vmul.f32 %v2191_v50, %v2187_v14 }
 0x55d   : > { %v2196_v51 = vmul.f32 %v2192_v47, %v2188_v45 }
 0x55f   : > { %v2199_v9 = vcombine.high %v2195_v34, %v2196_v51 }
 0x561   : > { %v2201_v12 = vadd.f32 %v2199_v9, %v3478_v42 }
 0x563   : > { %2203 = vst [vmem:[%s294_s27] sm:$0xff] %v2201_v12 }
 0x564   : > { %2638 = shalt.err (!%p2635_p6)
}
 0x565   : > { %s2639_s17 = scalar_lea.hbm %s2217_s16, 128  ;;  %s2643_s13 = scalar_lea.hbm %s3661_s5, 256 }
 0x566   : > { %p2640_p7 = scmp.ne.s32.totalorder %s2217_s16, %s2639_s17  ;;  %p2644_p4 = scmp.lt.s32.totalorder %s2217_s16, %s3661_s5 }
 0x567   : > { %p2645_p10 = scmp.lt.s32.totalorder %s2643_s13, %s2639_s17 }
 0x568   : > { %p2641_p1 = pnand %p2640_p7, %p2806_p9 }
 0x569   : > { %p2646_p8 = por %p2645_p10, %p2644_p4 }
 0x56a   : > { %p2642_p2 = pneg %p2641_p1 }
 0x56c   : > { %p2647_p0 = pnand %p2646_p8, %p2642_p2 }
 0x56e   : > { %2650 = shalt.err (!%p2647_p0)
}
 0x56f   : > { %2443 = dma.vmem_to_hbm [thread:$0]  (%p2806_p9), %s2220_s29, 128, %s2217_s16, %s2205_s24  }
 0x570 PF: > { %s2231_s25 = sand.u32 1, %s2689_s18   ;;  %p3670_p3 = scmp.ge.s32.totalorder %s2709_s23, 2 }
 0x571   : > { %s2232_s27 = scalar_lea.sflag [#allocation7], %s2231_s25 }
 0x572   : > { %p2453_p13 = pnand %p3670_p3, %p2813_p11 }
 0x574   : > { %p2454_p5 = pneg %p2453_p13 }
 0x576   : > { %2684 = dma.done.wait (%p2454_p5), %s2232_s27, 128  }
 0x577   : > { %2686 = vsyncadd (%p2454_p5), %s2232_s27, 4294967168  ;;  %s24_s23 = sadd.s32 1, %s2709_s23   ;;  %s3671_s18 = smov %s2693_s19 }
 0x578   : > { %p21_p12 = scmp.ge.s32.totalorder %s24_s23, 4   ;;  %s3672_s19 = smov %s2697_s20 }
 0x579   : > { %s3673_s20 = smov %s2811_s7  ;;  %s3674_s21 = smov %s2705_s22 }
 0x57a   : > { %s3675_s22 = smov %s3677_s26  ;;  %23 = sbr.rel (!%p21_p12) target bundleno = 10 (0xa), region = 102 }
 0x57f   :  { %2237 = vsyncpa [#allocation6], 1 }
 0x580   :  { %2239 = vsyncpa [#allocation6 + $0x1], 1 }
 0x581   :  { %2240 = vsyncpa [#allocation9], 1 }
 0x582   :  { %2242 = vsyncpa [#allocation9 + $0x1], 1 }
 0x583   :  { %2243 = vsyncpa [#allocation7], 1 }
 0x584   :  { %2245 = vsyncpa [#allocation7 + $0x1], 1 }

</bundles_post_ra>
